<compile_context>
chip_gen: v5e
topology: v5e:2x2
jax: 0.10.0
libtpu: 0.0.40
codegen_flags: <defaults>
</compile_context>

<pallas_src>
import functools

import jax
import jax.numpy as jnp
from jax.experimental import pallas as pl
from jax.experimental.pallas import tpu as pltpu

PMAX = 4          # half-width of the widest separable kernel (K = 9)
NTAPS = 2 * PMAX + 1


def _conpy_kernel(x_ref,          # (1, Cin, HW)            VMEM
                  col_ref,        # (1, HW) int32           VMEM (w index per flat pos)
                  w13_ref,        # (o1 + o3, Cin)          VMEM
                  b1_ref,         # (o1, 1)                 VMEM
                  b3_ref,         # (o3, 1)                 VMEM
                  wa_ref,         # (9, 4*o20, Cin)         VMEM packed (1,K) taps
                  wb_ref,         # (9, 4*o21, 4*o20)       VMEM packed (K,1) taps
                  b2_ref,         # (4*o21, 1)              VMEM effective bias
                  out_ref,        # (1, Ctot, HW)           VMEM
                  xs_ref,         # (Cin, 2*xpad + HW)      VMEM scratch (W shifts)
                  d_ref,          # (4*o20, 2*halo + HW)    VMEM scratch (H halo)
                  *, width, xpad, halo, pmax):
    Cin = x_ref.shape[1]
    HW = x_ref.shape[2]
    o1 = b1_ref.shape[0]
    o3 = b3_ref.shape[0]
    o2mid = wa_ref.shape[1]
    o2out = wb_ref.shape[1]
    ntaps = wa_ref.shape[0]

    x = x_ref[0]                       # (Cin, HW)
    col = col_ref[...]                 # (1, HW) int32, value = flat index mod W

    # ---- branch 1 + branch 3 1x1 convs: one fused matmul -------------------
    y13 = jnp.dot(w13_ref[...], x, preferred_element_type=jnp.float32)
    out_ref[0, 0:o1, :] = jnp.maximum(y13[:o1] + b1_ref[...], 0.0)
    # global avg pool -> 1x1 conv commutes with the matmul; 1x1 bilinear
    # upsample is a broadcast.
    v3 = jnp.mean(y13[o1:], axis=1, keepdims=True) + b3_ref[...]        # (o3, 1)
    out_ref[0, o1 + o2out:, :] = jnp.broadcast_to(
        jnp.maximum(v3, 0.0), (o3, HW))

    # ---- branch 2, first (1,K) convs of all four streams, tap-outer --------
    # Lane-padded copy of x so each of the 9 W-shifts is an in-bounds static
    # slice; row-boundary leakage is removed by the per-tap mask.
    xs_ref[:, :xpad] = jnp.zeros((Cin, xpad), jnp.float32)
    xs_ref[:, xpad + HW:] = jnp.zeros((Cin, xpad), jnp.float32)
    xs_ref[:, xpad:xpad + HW] = x

    acc1 = jnp.zeros((o2mid, HW), jnp.float32)
    for t in range(ntaps):
        s = t - pmax
        slab = xs_ref[:, xpad + s: xpad + s + HW]          # (Cin, HW) == x[:, i+s]
        if s != 0:
            cs = col + s
            valid = jnp.logical_and(cs >= 0, cs < width)   # zero-pad in W
            slab = jnp.where(valid, slab, 0.0)
        acc1 = acc1 + jnp.dot(wa_ref[t], slab,
                              preferred_element_type=jnp.float32)

    # H-halo-padded intermediate (halo rows stay zero; the first conv's bias
    # is folded into b2_ref on the host, so zeros are exactly right).
    d_ref[:, :halo] = jnp.zeros((o2mid, halo), jnp.float32)
    d_ref[:, halo + HW:] = jnp.zeros((o2mid, halo), jnp.float32)
    d_ref[:, halo:halo + HW] = acc1

    # ---- branch 2, second (K,1) convs, tap-outer (row shifts) --------------
    acc2 = jnp.zeros((o2out, HW), jnp.float32)
    for t in range(ntaps):
        dh = t - pmax
        off = halo + dh * width
        dv = d_ref[:, off: off + HW]                        # (4*o20, HW)
        acc2 = acc2 + jnp.dot(wb_ref[t], dv,
                              preferred_element_type=jnp.float32)
    out_ref[0, o1:o1 + o2out, :] = jnp.maximum(acc2 + b2_ref[...], 0.0)


@jax.jit
def conpy_forward(x, params):
    N, Cin, H, W = x.shape
    HW = H * W
    o1 = params['w_b1'].shape[0]
    o20 = params['w_s3_1'].shape[0]
    o21 = params['w_s3_2'].shape[0]
    o3 = params['w_b3'].shape[0]
    o2mid, o2out = 4 * o20, 4 * o21
    Ctot = o1 + o2out + o3

    xpad = 128                                        # >= PMAX, lane-aligned
    halo = ((PMAX * W + 127) // 128) * 128            # >= PMAX*W, lane-aligned

    # Free relayout: the kernel works on lane-dense (Cin, H*W) slabs.
    x_flat = x.reshape(N, Cin, HW)
    # Column-within-row index per flat position (for W-edge masking).
    col = jnp.tile(jnp.arange(W, dtype=jnp.int32), H)[None, :]

    hi = jax.lax.Precision.HIGHEST
    w13 = jnp.concatenate([params['w_b1'][:, :, 0, 0],
                           params['w_b3'][:, :, 0, 0]], axis=0)      # (o1+o3, Cin)
    b1v = params['b_b1'][:, None]
    b3v = params['b_b3'][:, None]

    # Packed per-tap weight matrices (streams fused; unused taps stay zero).
    wa = jnp.zeros((NTAPS, o2mid, Cin), jnp.float32)
    wb = jnp.zeros((NTAPS, o2out, o2mid), jnp.float32)
    b2 = jnp.zeros((o2out,), jnp.float32)
    for st, K in enumerate((3, 5, 7, 9)):
        p = (K - 1) // 2
        w1 = params[f'w_s{K}_1'][:, :, 0, :]          # (o20, Cin, K)
        w2 = params[f'w_s{K}_2'][:, :, :, 0]          # (o21, o20, K)
        for k in range(K):
            t = k - p + PMAX                           # tap index for shift k - p
            wa = wa.at[t, st * o20:(st + 1) * o20, :].set(w1[:, :, k])
            wb = wb.at[t, st * o21:(st + 1) * o21,
                       st * o20:(st + 1) * o20].set(w2[:, :, k])
        # fold the first conv's bias into the second conv's bias
        b2 = b2.at[st * o21:(st + 1) * o21].set(
            params[f'b_s{K}_2'] +
            jnp.einsum('ock,c->o', w2, params[f'b_s{K}_1'], precision=hi))
    b2v = b2[:, None]

    kern = functools.partial(_conpy_kernel, width=W, xpad=xpad, halo=halo,
                             pmax=PMAX)

    def full(a):  # whole array resident in VMEM, constant index map
        return pl.BlockSpec(a.shape, lambda n, _z=(0,) * a.ndim: _z)

    out = pl.pallas_call(
        kern,
        out_shape=jax.ShapeDtypeStruct((N, Ctot, HW), jnp.float32),
        grid=(N,),
        in_specs=[pl.BlockSpec((1, Cin, HW), lambda n: (n, 0, 0)),
                  full(col), full(w13), full(b1v), full(b3v),
                  full(wa), full(wb), full(b2v)],
        out_specs=pl.BlockSpec((1, Ctot, HW), lambda n: (n, 0, 0)),
        scratch_shapes=[pltpu.VMEM((Cin, 2 * xpad + HW), jnp.float32),
                        pltpu.VMEM((o2mid, 2 * halo + HW), jnp.float32)],
        compiler_params=pltpu.CompilerParams(
            dimension_semantics=("parallel",)),
    )(x_flat, col, w13, b1v, b3v, wa, wb, b2v)

    return out.reshape(N, Ctot, H, W)


def _init_params(key, cin, o1, o2, o3):
    """Deterministic synthetic parameters (PyTorch-like uniform fan-in init)."""
    o20, o21 = o2

    def conv_init(k, oc, ic, kh, kw):
        k1, k2 = jax.random.split(k)
        bound = 1.0 / float(ic * kh * kw) ** 0.5
        w = jax.random.uniform(k1, (oc, ic, kh, kw), jnp.float32, -bound, bound)
        b = jax.random.uniform(k2, (oc,), jnp.float32, -bound, bound)
        return w, b

    keys = jax.random.split(key, 10)
    p = {}
    p['w_b1'], p['b_b1'] = conv_init(keys[0], o1, cin, 1, 1)
    for i, K in enumerate((3, 5, 7, 9)):
        p[f'w_s{K}_1'], p[f'b_s{K}_1'] = conv_init(keys[1 + 2 * i], o20, cin, 1, K)
        p[f'w_s{K}_2'], p[f'b_s{K}_2'] = conv_init(keys[2 + 2 * i], o21, o20, K, 1)
    p['w_b3'], p['b_b3'] = conv_init(keys[9], o3, cin, 1, 1)
    return p


def conpy_reference(x, p):
    """Pure-JAX (XLA conv, highest precision) reference of the PyTorch forward."""
    hi = jax.lax.Precision.HIGHEST

    def conv(inp, w, b, pad):
        dn = jax.lax.conv_dimension_numbers(inp.shape, w.shape,
                                            ('NCHW', 'OIHW', 'NCHW'))
        y = jax.lax.conv_general_dilated(inp, w, (1, 1), pad,
                                         dimension_numbers=dn, precision=hi)
        return y + b[None, :, None, None]

    N, _, H, W = x.shape
    outs = [conv(x, p['w_b1'], p['b_b1'], 'VALID')]
    for K in (3, 5, 7, 9):
        pd = (K - 1) // 2
        y = conv(x, p[f'w_s{K}_1'], p[f'b_s{K}_1'], [(pd, pd), (pd, pd)])
        y = conv(y, p[f'w_s{K}_2'], p[f'b_s{K}_2'], 'VALID')
        outs.append(y)
    pooled = jnp.mean(x, axis=(2, 3), keepdims=True)
    b3 = conv(pooled, p['w_b3'], p['b_b3'], 'VALID')
    outs.append(jnp.broadcast_to(b3, (N, b3.shape[1], H, W)))  # 1x1 bilinear up == broadcast
    return jax.nn.relu(jnp.concatenate(outs, axis=1))


if __name__ == "__main__":
    key = jax.random.PRNGKey(0)
    kx, kp = jax.random.split(key)

    # small shapes consistent with the module: conpy(4, 4, (8, 8), 4, (16, 16))
    N, Cin, H, W = 2, 4, 16, 16
    o1, o2, o3 = 4, (8, 8), 4

    x = jax.random.normal(kx, (N, Cin, H, W), jnp.float32)
    params = _init_params(kp, Cin, o1, o2, o3)

    out = jax.block_until_ready(conpy_forward(x, params))

    ref = conpy_reference(x, params)
    assert out.shape == ref.shape == (N, o1 + 4 * o2[1] + o3, H, W)
    err = float(jnp.max(jnp.abs(out - ref)))
    # The in-kernel f32 matmuls may execute as bf16 MXU passes under default
    # precision, while the reference runs at Precision.HIGHEST; allow a
    # correspondingly loose (but still structural-bug-catching) bound.
    if err > 3e-2:
        raise AssertionError(f"Pallas output mismatch vs reference: max abs err = {err}")

    print("KERNEL_OK")
</pallas_src>

<mosaic_0001>
module attributes {stable_mosaic.version = 11 : i64} {
  func.func @_conpy_kernel(%arg0: i32, %arg1: memref<1x4x256xf32, #tpu.memory_space<vmem>>, %arg2: memref<1x256xi32, #tpu.memory_space<vmem>>, %arg3: memref<8x4xf32, #tpu.memory_space<vmem>>, %arg4: memref<4x1xf32, #tpu.memory_space<vmem>>, %arg5: memref<4x1xf32, #tpu.memory_space<vmem>>, %arg6: memref<9x32x4xf32, #tpu.memory_space<vmem>>, %arg7: memref<9x32x32xf32, #tpu.memory_space<vmem>>, %arg8: memref<32x1xf32, #tpu.memory_space<vmem>>, %arg9: memref<1x40x256xf32, #tpu.memory_space<vmem>>, %arg10: memref<4x512xf32, #tpu.memory_space<vmem>>, %arg11: memref<32x512xf32, #tpu.memory_space<vmem>>) attributes {dimension_semantics = [#tpu.dimension_semantics<parallel>], iteration_bounds = array<i64: 2>, scalar_prefetch = 0 : i64, scratch_operands = 2 : i64, tpu.core_type = #tpu.core_type<tc>, window_params = [{transform_indices = @transform_0, window_bounds = array<i64: 1, 4, 256>}, {pipeline_mode = #tpu.pipeline_mode<synchronous>, transform_indices = @transform_1, window_bounds = array<i64: 1, 256>}, {pipeline_mode = #tpu.pipeline_mode<synchronous>, transform_indices = @transform_2, window_bounds = array<i64: 8, 4>}, {pipeline_mode = #tpu.pipeline_mode<synchronous>, transform_indices = @transform_3, window_bounds = array<i64: 4, 1>}, {pipeline_mode = #tpu.pipeline_mode<synchronous>, transform_indices = @transform_4, window_bounds = array<i64: 4, 1>}, {pipeline_mode = #tpu.pipeline_mode<synchronous>, transform_indices = @transform_5, window_bounds = array<i64: 9, 32, 4>}, {pipeline_mode = #tpu.pipeline_mode<synchronous>, transform_indices = @transform_6, window_bounds = array<i64: 9, 32, 32>}, {pipeline_mode = #tpu.pipeline_mode<synchronous>, transform_indices = @transform_7, window_bounds = array<i64: 32, 1>}, {transform_indices = @transform_8, window_bounds = array<i64: 1, 40, 256>}]} {
    %c0 = arith.constant 0 : index
    %c0_0 = arith.constant 0 : index
    %c0_1 = arith.constant 0 : index
    %0 = vector.load %arg1[%c0, %c0_0, %c0_1] : memref<1x4x256xf32, #tpu.memory_space<vmem>>, vector<1x4x256xf32>
    %1 = vector.shape_cast %0 : vector<1x4x256xf32> to vector<4x256xf32>
    %c0_2 = arith.constant 0 : index
    %c0_3 = arith.constant 0 : index
    %2 = vector.load %arg2[%c0_2, %c0_3] : memref<1x256xi32, #tpu.memory_space<vmem>>, vector<1x256xi32>
    %c0_4 = arith.constant 0 : index
    %c0_5 = arith.constant 0 : index
    %3 = vector.load %arg3[%c0_4, %c0_5] : memref<8x4xf32, #tpu.memory_space<vmem>>, vector<8x4xf32>
    %cst = arith.constant dense<0.000000e+00> : vector<8x256xf32>
    %4 = tpu.matmul %3, %1, %cst {dimension_numbers = #tpu.dot_dimension_numbers<[1], [0], [0], [1], [0, 0, 1, 1], [], []>} : vector<8x4xf32>, vector<4x256xf32>, vector<8x256xf32> -> vector<8x256xf32>
    %5 = vector.extract_strided_slice %4 {offsets = [0, 0], sizes = [4, 256], strides = [1, 1]} : vector<8x256xf32> to vector<4x256xf32>
    %c0_6 = arith.constant 0 : index
    %c0_7 = arith.constant 0 : index
    %6 = vector.load %arg4[%c0_6, %c0_7] : memref<4x1xf32, #tpu.memory_space<vmem>>, vector<4x1xf32>
    %7 = vector.broadcast %6 : vector<4x1xf32> to vector<4x256xf32>
    %8 = arith.addf %5, %7 : vector<4x256xf32>
    %cst_8 = arith.constant 0.000000e+00 : f32
    %9 = vector.broadcast %cst_8 : f32 to vector<4x256xf32>
    %10 = arith.maximumf %8, %9 : vector<4x256xf32>
    %c0_9 = arith.constant 0 : index
    %c0_10 = arith.constant 0 : index
    %c0_11 = arith.constant 0 : index
    %11 = vector.load %arg9[%c0_9, %c0_10, %c0_11] : memref<1x40x256xf32, #tpu.memory_space<vmem>>, vector<1x4x256xf32>
    %12 = vector.shape_cast %11 : vector<1x4x256xf32> to vector<4x256xf32>
    %13 = vector.shape_cast %10 : vector<4x256xf32> to vector<1x4x256xf32>
    tpu.vector_store %arg9[%c0_9, %c0_10, %c0_11], %13 {strides = array<i32>} : memref<1x40x256xf32, #tpu.memory_space<vmem>>, vector<1x4x256xf32>,
    %14 = vector.extract_strided_slice %4 {offsets = [4, 0], sizes = [4, 256], strides = [1, 1]} : vector<8x256xf32> to vector<4x256xf32>
    %cst_12 = arith.constant dense<0.000000e+00> : vector<4xf32>
    %15 = vector.multi_reduction <add>, %14, %cst_12 [1] : vector<4x256xf32> to vector<4xf32>
    %16 = vector.shape_cast %15 : vector<4xf32> to vector<4x1xf32>
    %cst_13 = arith.constant 2.560000e+02 : f32
    %17 = vector.broadcast %cst_13 : f32 to vector<4x1xf32>
    %18 = arith.divf %16, %17 : vector<4x1xf32>
    %c0_14 = arith.constant 0 : index
    %c0_15 = arith.constant 0 : index
    %19 = vector.load %arg5[%c0_14, %c0_15] : memref<4x1xf32, #tpu.memory_space<vmem>>, vector<4x1xf32>
    %20 = arith.addf %18, %19 : vector<4x1xf32>
    %cst_16 = arith.constant 0.000000e+00 : f32
    %21 = vector.broadcast %cst_16 : f32 to vector<4x1xf32>
    %22 = arith.maximumf %20, %21 : vector<4x1xf32>
    %23 = vector.shape_cast %22 : vector<4x1xf32> to vector<4x1xf32>
    %24 = vector.broadcast %23 : vector<4x1xf32> to vector<4x256xf32>
    %c0_17 = arith.constant 0 : index
    %c36 = arith.constant 36 : index
    %c0_18 = arith.constant 0 : index
    %25 = vector.load %arg9[%c0_17, %c36, %c0_18] : memref<1x40x256xf32, #tpu.memory_space<vmem>>, vector<1x4x256xf32>
    %26 = vector.shape_cast %25 : vector<1x4x256xf32> to vector<4x256xf32>
    %27 = vector.shape_cast %24 : vector<4x256xf32> to vector<1x4x256xf32>
    tpu.vector_store %arg9[%c0_17, %c36, %c0_18], %27 {strides = array<i32>} : memref<1x40x256xf32, #tpu.memory_space<vmem>>, vector<1x4x256xf32>,
    %cst_19 = arith.constant 0.000000e+00 : f32
    %28 = vector.broadcast %cst_19 : f32 to vector<4x128xf32>
    %c0_20 = arith.constant 0 : index
    %c0_21 = arith.constant 0 : index
    %29 = vector.load %arg10[%c0_20, %c0_21] : memref<4x512xf32, #tpu.memory_space<vmem>>, vector<4x128xf32>
    tpu.vector_store %arg10[%c0_20, %c0_21], %28 {strides = array<i32>} : memref<4x512xf32, #tpu.memory_space<vmem>>, vector<4x128xf32>,
    %cst_22 = arith.constant 0.000000e+00 : f32
    %30 = vector.broadcast %cst_22 : f32 to vector<4x128xf32>
    %c0_23 = arith.constant 0 : index
    %c384 = arith.constant 384 : index
    %31 = vector.load %arg10[%c0_23, %c384] : memref<4x512xf32, #tpu.memory_space<vmem>>, vector<4x128xf32>
    tpu.vector_store %arg10[%c0_23, %c384], %30 {strides = array<i32>} : memref<4x512xf32, #tpu.memory_space<vmem>>, vector<4x128xf32>,
    %c0_24 = arith.constant 0 : index
    %c128 = arith.constant 128 : index
    %32 = vector.load %arg10[%c0_24, %c128] : memref<4x512xf32, #tpu.memory_space<vmem>>, vector<4x256xf32>
    tpu.vector_store %arg10[%c0_24, %c128], %1 {strides = array<i32>} : memref<4x512xf32, #tpu.memory_space<vmem>>, vector<4x256xf32>,
    %cst_25 = arith.constant 0.000000e+00 : f32
    %33 = vector.broadcast %cst_25 : f32 to vector<32x256xf32>
    %c0_26 = arith.constant 0 : index
    %c124 = arith.constant 124 : index
    %34 = vector.load %arg10[%c0_26, %c124] : memref<4x512xf32, #tpu.memory_space<vmem>>, vector<4x256xf32>
    %c-4_i32 = arith.constant -4 : i32
    %35 = vector.broadcast %c-4_i32 : i32 to vector<1x256xi32>
    %36 = arith.addi %2, %35 : vector<1x256xi32>
    %c0_i32 = arith.constant 0 : i32
    %37 = vector.broadcast %c0_i32 : i32 to vector<1x256xi32>
    %38 = arith.cmpi sge, %36, %37 : vector<1x256xi32>
    %c16_i32 = arith.constant 16 : i32
    %39 = vector.broadcast %c16_i32 : i32 to vector<1x256xi32>
    %40 = arith.cmpi slt, %36, %39 : vector<1x256xi32>
    %41 = arith.andi %38, %40 : vector<1x256xi1>
    %cst_27 = arith.constant 0.000000e+00 : f32
    %42 = vector.shape_cast %41 : vector<1x256xi1> to vector<1x256xi1>
    %43 = vector.broadcast %42 : vector<1x256xi1> to vector<4x256xi1>
    %44 = vector.broadcast %cst_27 : f32 to vector<4x256xf32>
    %45 = arith.select %43, %34, %44 : vector<4x256xi1>, vector<4x256xf32>
    %c0_28 = arith.constant 0 : index
    %c0_29 = arith.constant 0 : index
    %c0_30 = arith.constant 0 : index
    %46 = vector.load %arg6[%c0_28, %c0_29, %c0_30] : memref<9x32x4xf32, #tpu.memory_space<vmem>>, vector<1x32x4xf32>
    %47 = vector.shape_cast %46 : vector<1x32x4xf32> to vector<32x4xf32>
    %cst_31 = arith.constant dense<0.000000e+00> : vector<32x256xf32>
    %48 = tpu.matmul %47, %45, %cst_31 {dimension_numbers = #tpu.dot_dimension_numbers<[1], [0], [0], [1], [0, 0, 1, 1], [], []>} : vector<32x4xf32>, vector<4x256xf32>, vector<32x256xf32> -> vector<32x256xf32>
    %49 = arith.addf %33, %48 : vector<32x256xf32>
    %c0_32 = arith.constant 0 : index
    %c125 = arith.constant 125 : index
    %50 = vector.load %arg10[%c0_32, %c125] : memref<4x512xf32, #tpu.memory_space<vmem>>, vector<4x256xf32>
    %c-3_i32 = arith.constant -3 : i32
    %51 = vector.broadcast %c-3_i32 : i32 to vector<1x256xi32>
    %52 = arith.addi %2, %51 : vector<1x256xi32>
    %c0_i32_33 = arith.constant 0 : i32
    %53 = vector.broadcast %c0_i32_33 : i32 to vector<1x256xi32>
    %54 = arith.cmpi sge, %52, %53 : vector<1x256xi32>
    %c16_i32_34 = arith.constant 16 : i32
    %55 = vector.broadcast %c16_i32_34 : i32 to vector<1x256xi32>
    %56 = arith.cmpi slt, %52, %55 : vector<1x256xi32>
    %57 = arith.andi %54, %56 : vector<1x256xi1>
    %cst_35 = arith.constant 0.000000e+00 : f32
    %58 = vector.shape_cast %57 : vector<1x256xi1> to vector<1x256xi1>
    %59 = vector.broadcast %58 : vector<1x256xi1> to vector<4x256xi1>
    %60 = vector.broadcast %cst_35 : f32 to vector<4x256xf32>
    %61 = arith.select %59, %50, %60 : vector<4x256xi1>, vector<4x256xf32>
    %c1 = arith.constant 1 : index
    %c0_36 = arith.constant 0 : index
    %c0_37 = arith.constant 0 : index
    %62 = vector.load %arg6[%c1, %c0_36, %c0_37] : memref<9x32x4xf32, #tpu.memory_space<vmem>>, vector<1x32x4xf32>
    %63 = vector.shape_cast %62 : vector<1x32x4xf32> to vector<32x4xf32>
    %cst_38 = arith.constant dense<0.000000e+00> : vector<32x256xf32>
    %64 = tpu.matmul %63, %61, %cst_38 {dimension_numbers = #tpu.dot_dimension_numbers<[1], [0], [0], [1], [0, 0, 1, 1], [], []>} : vector<32x4xf32>, vector<4x256xf32>, vector<32x256xf32> -> vector<32x256xf32>
    %65 = arith.addf %49, %64 : vector<32x256xf32>
    %c0_39 = arith.constant 0 : index
    %c126 = arith.constant 126 : index
    %66 = vector.load %arg10[%c0_39, %c126] : memref<4x512xf32, #tpu.memory_space<vmem>>, vector<4x256xf32>
    %c-2_i32 = arith.constant -2 : i32
    %67 = vector.broadcast %c-2_i32 : i32 to vector<1x256xi32>
    %68 = arith.addi %2, %67 : vector<1x256xi32>
    %c0_i32_40 = arith.constant 0 : i32
    %69 = vector.broadcast %c0_i32_40 : i32 to vector<1x256xi32>
    %70 = arith.cmpi sge, %68, %69 : vector<1x256xi32>
    %c16_i32_41 = arith.constant 16 : i32
    %71 = vector.broadcast %c16_i32_41 : i32 to vector<1x256xi32>
    %72 = arith.cmpi slt, %68, %71 : vector<1x256xi32>
    %73 = arith.andi %70, %72 : vector<1x256xi1>
    %cst_42 = arith.constant 0.000000e+00 : f32
    %74 = vector.shape_cast %73 : vector<1x256xi1> to vector<1x256xi1>
    %75 = vector.broadcast %74 : vector<1x256xi1> to vector<4x256xi1>
    %76 = vector.broadcast %cst_42 : f32 to vector<4x256xf32>
    %77 = arith.select %75, %66, %76 : vector<4x256xi1>, vector<4x256xf32>
    %c2 = arith.constant 2 : index
    %c0_43 = arith.constant 0 : index
    %c0_44 = arith.constant 0 : index
    %78 = vector.load %arg6[%c2, %c0_43, %c0_44] : memref<9x32x4xf32, #tpu.memory_space<vmem>>, vector<1x32x4xf32>
    %79 = vector.shape_cast %78 : vector<1x32x4xf32> to vector<32x4xf32>
    %cst_45 = arith.constant dense<0.000000e+00> : vector<32x256xf32>
    %80 = tpu.matmul %79, %77, %cst_45 {dimension_numbers = #tpu.dot_dimension_numbers<[1], [0], [0], [1], [0, 0, 1, 1], [], []>} : vector<32x4xf32>, vector<4x256xf32>, vector<32x256xf32> -> vector<32x256xf32>
    %81 = arith.addf %65, %80 : vector<32x256xf32>
    %c0_46 = arith.constant 0 : index
    %c127 = arith.constant 127 : index
    %82 = vector.load %arg10[%c0_46, %c127] : memref<4x512xf32, #tpu.memory_space<vmem>>, vector<4x256xf32>
    %c-1_i32 = arith.constant -1 : i32
    %83 = vector.broadcast %c-1_i32 : i32 to vector<1x256xi32>
    %84 = arith.addi %2, %83 : vector<1x256xi32>
    %c0_i32_47 = arith.constant 0 : i32
    %85 = vector.broadcast %c0_i32_47 : i32 to vector<1x256xi32>
    %86 = arith.cmpi sge, %84, %85 : vector<1x256xi32>
    %c16_i32_48 = arith.constant 16 : i32
    %87 = vector.broadcast %c16_i32_48 : i32 to vector<1x256xi32>
    %88 = arith.cmpi slt, %84, %87 : vector<1x256xi32>
    %89 = arith.andi %86, %88 : vector<1x256xi1>
    %cst_49 = arith.constant 0.000000e+00 : f32
    %90 = vector.shape_cast %89 : vector<1x256xi1> to vector<1x256xi1>
    %91 = vector.broadcast %90 : vector<1x256xi1> to vector<4x256xi1>
    %92 = vector.broadcast %cst_49 : f32 to vector<4x256xf32>
    %93 = arith.select %91, %82, %92 : vector<4x256xi1>, vector<4x256xf32>
    %c3 = arith.constant 3 : index
    %c0_50 = arith.constant 0 : index
    %c0_51 = arith.constant 0 : index
    %94 = vector.load %arg6[%c3, %c0_50, %c0_51] : memref<9x32x4xf32, #tpu.memory_space<vmem>>, vector<1x32x4xf32>
    %95 = vector.shape_cast %94 : vector<1x32x4xf32> to vector<32x4xf32>
    %cst_52 = arith.constant dense<0.000000e+00> : vector<32x256xf32>
    %96 = tpu.matmul %95, %93, %cst_52 {dimension_numbers = #tpu.dot_dimension_numbers<[1], [0], [0], [1], [0, 0, 1, 1], [], []>} : vector<32x4xf32>, vector<4x256xf32>, vector<32x256xf32> -> vector<32x256xf32>
    %97 = arith.addf %81, %96 : vector<32x256xf32>
    %c0_53 = arith.constant 0 : index
    %c128_54 = arith.constant 128 : index
    %98 = vector.load %arg10[%c0_53, %c128_54] : memref<4x512xf32, #tpu.memory_space<vmem>>, vector<4x256xf32>
    %c4 = arith.constant 4 : index
    %c0_55 = arith.constant 0 : index
    %c0_56 = arith.constant 0 : index
    %99 = vector.load %arg6[%c4, %c0_55, %c0_56] : memref<9x32x4xf32, #tpu.memory_space<vmem>>, vector<1x32x4xf32>
    %100 = vector.shape_cast %99 : vector<1x32x4xf32> to vector<32x4xf32>
    %cst_57 = arith.constant dense<0.000000e+00> : vector<32x256xf32>
    %101 = tpu.matmul %100, %98, %cst_57 {dimension_numbers = #tpu.dot_dimension_numbers<[1], [0], [0], [1], [0, 0, 1, 1], [], []>} : vector<32x4xf32>, vector<4x256xf32>, vector<32x256xf32> -> vector<32x256xf32>
    %102 = arith.addf %97, %101 : vector<32x256xf32>
    %c0_58 = arith.constant 0 : index
    %c129 = arith.constant 129 : index
    %103 = vector.load %arg10[%c0_58, %c129] : memref<4x512xf32, #tpu.memory_space<vmem>>, vector<4x256xf32>
    %c1_i32 = arith.constant 1 : i32
    %104 = vector.broadcast %c1_i32 : i32 to vector<1x256xi32>
    %105 = arith.addi %2, %104 : vector<1x256xi32>
    %c0_i32_59 = arith.constant 0 : i32
    %106 = vector.broadcast %c0_i32_59 : i32 to vector<1x256xi32>
    %107 = arith.cmpi sge, %105, %106 : vector<1x256xi32>
    %c16_i32_60 = arith.constant 16 : i32
    %108 = vector.broadcast %c16_i32_60 : i32 to vector<1x256xi32>
    %109 = arith.cmpi slt, %105, %108 : vector<1x256xi32>
    %110 = arith.andi %107, %109 : vector<1x256xi1>
    %cst_61 = arith.constant 0.000000e+00 : f32
    %111 = vector.shape_cast %110 : vector<1x256xi1> to vector<1x256xi1>
    %112 = vector.broadcast %111 : vector<1x256xi1> to vector<4x256xi1>
    %113 = vector.broadcast %cst_61 : f32 to vector<4x256xf32>
    %114 = arith.select %112, %103, %113 : vector<4x256xi1>, vector<4x256xf32>
    %c5 = arith.constant 5 : index
    %c0_62 = arith.constant 0 : index
    %c0_63 = arith.constant 0 : index
    %115 = vector.load %arg6[%c5, %c0_62, %c0_63] : memref<9x32x4xf32, #tpu.memory_space<vmem>>, vector<1x32x4xf32>
    %116 = vector.shape_cast %115 : vector<1x32x4xf32> to vector<32x4xf32>
    %cst_64 = arith.constant dense<0.000000e+00> : vector<32x256xf32>
    %117 = tpu.matmul %116, %114, %cst_64 {dimension_numbers = #tpu.dot_dimension_numbers<[1], [0], [0], [1], [0, 0, 1, 1], [], []>} : vector<32x4xf32>, vector<4x256xf32>, vector<32x256xf32> -> vector<32x256xf32>
    %118 = arith.addf %102, %117 : vector<32x256xf32>
    %c0_65 = arith.constant 0 : index
    %c130 = arith.constant 130 : index
    %119 = vector.load %arg10[%c0_65, %c130] : memref<4x512xf32, #tpu.memory_space<vmem>>, vector<4x256xf32>
    %c2_i32 = arith.constant 2 : i32
    %120 = vector.broadcast %c2_i32 : i32 to vector<1x256xi32>
    %121 = arith.addi %2, %120 : vector<1x256xi32>
    %c0_i32_66 = arith.constant 0 : i32
    %122 = vector.broadcast %c0_i32_66 : i32 to vector<1x256xi32>
    %123 = arith.cmpi sge, %121, %122 : vector<1x256xi32>
    %c16_i32_67 = arith.constant 16 : i32
    %124 = vector.broadcast %c16_i32_67 : i32 to vector<1x256xi32>
    %125 = arith.cmpi slt, %121, %124 : vector<1x256xi32>
    %126 = arith.andi %123, %125 : vector<1x256xi1>
    %cst_68 = arith.constant 0.000000e+00 : f32
    %127 = vector.shape_cast %126 : vector<1x256xi1> to vector<1x256xi1>
    %128 = vector.broadcast %127 : vector<1x256xi1> to vector<4x256xi1>
    %129 = vector.broadcast %cst_68 : f32 to vector<4x256xf32>
    %130 = arith.select %128, %119, %129 : vector<4x256xi1>, vector<4x256xf32>
    %c6 = arith.constant 6 : index
    %c0_69 = arith.constant 0 : index
    %c0_70 = arith.constant 0 : index
    %131 = vector.load %arg6[%c6, %c0_69, %c0_70] : memref<9x32x4xf32, #tpu.memory_space<vmem>>, vector<1x32x4xf32>
    %132 = vector.shape_cast %131 : vector<1x32x4xf32> to vector<32x4xf32>
    %cst_71 = arith.constant dense<0.000000e+00> : vector<32x256xf32>
    %133 = tpu.matmul %132, %130, %cst_71 {dimension_numbers = #tpu.dot_dimension_numbers<[1], [0], [0], [1], [0, 0, 1, 1], [], []>} : vector<32x4xf32>, vector<4x256xf32>, vector<32x256xf32> -> vector<32x256xf32>
    %134 = arith.addf %118, %133 : vector<32x256xf32>
    %c0_72 = arith.constant 0 : index
    %c131 = arith.constant 131 : index
    %135 = vector.load %arg10[%c0_72, %c131] : memref<4x512xf32, #tpu.memory_space<vmem>>, vector<4x256xf32>
    %c3_i32 = arith.constant 3 : i32
    %136 = vector.broadcast %c3_i32 : i32 to vector<1x256xi32>
    %137 = arith.addi %2, %136 : vector<1x256xi32>
    %c0_i32_73 = arith.constant 0 : i32
    %138 = vector.broadcast %c0_i32_73 : i32 to vector<1x256xi32>
    %139 = arith.cmpi sge, %137, %138 : vector<1x256xi32>
    %c16_i32_74 = arith.constant 16 : i32
    %140 = vector.broadcast %c16_i32_74 : i32 to vector<1x256xi32>
    %141 = arith.cmpi slt, %137, %140 : vector<1x256xi32>
    %142 = arith.andi %139, %141 : vector<1x256xi1>
    %cst_75 = arith.constant 0.000000e+00 : f32
    %143 = vector.shape_cast %142 : vector<1x256xi1> to vector<1x256xi1>
    %144 = vector.broadcast %143 : vector<1x256xi1> to vector<4x256xi1>
    %145 = vector.broadcast %cst_75 : f32 to vector<4x256xf32>
    %146 = arith.select %144, %135, %145 : vector<4x256xi1>, vector<4x256xf32>
    %c7 = arith.constant 7 : index
    %c0_76 = arith.constant 0 : index
    %c0_77 = arith.constant 0 : index
    %147 = vector.load %arg6[%c7, %c0_76, %c0_77] : memref<9x32x4xf32, #tpu.memory_space<vmem>>, vector<1x32x4xf32>
    %148 = vector.shape_cast %147 : vector<1x32x4xf32> to vector<32x4xf32>
    %cst_78 = arith.constant dense<0.000000e+00> : vector<32x256xf32>
    %149 = tpu.matmul %148, %146, %cst_78 {dimension_numbers = #tpu.dot_dimension_numbers<[1], [0], [0], [1], [0, 0, 1, 1], [], []>} : vector<32x4xf32>, vector<4x256xf32>, vector<32x256xf32> -> vector<32x256xf32>
    %150 = arith.addf %134, %149 : vector<32x256xf32>
    %c0_79 = arith.constant 0 : index
    %c132 = arith.constant 132 : index
    %151 = vector.load %arg10[%c0_79, %c132] : memref<4x512xf32, #tpu.memory_space<vmem>>, vector<4x256xf32>
    %c4_i32 = arith.constant 4 : i32
    %152 = vector.broadcast %c4_i32 : i32 to vector<1x256xi32>
    %153 = arith.addi %2, %152 : vector<1x256xi32>
    %c0_i32_80 = arith.constant 0 : i32
    %154 = vector.broadcast %c0_i32_80 : i32 to vector<1x256xi32>
    %155 = arith.cmpi sge, %153, %154 : vector<1x256xi32>
    %c16_i32_81 = arith.constant 16 : i32
    %156 = vector.broadcast %c16_i32_81 : i32 to vector<1x256xi32>
    %157 = arith.cmpi slt, %153, %156 : vector<1x256xi32>
    %158 = arith.andi %155, %157 : vector<1x256xi1>
    %cst_82 = arith.constant 0.000000e+00 : f32
    %159 = vector.shape_cast %158 : vector<1x256xi1> to vector<1x256xi1>
    %160 = vector.broadcast %159 : vector<1x256xi1> to vector<4x256xi1>
    %161 = vector.broadcast %cst_82 : f32 to vector<4x256xf32>
    %162 = arith.select %160, %151, %161 : vector<4x256xi1>, vector<4x256xf32>
    %c8 = arith.constant 8 : index
    %c0_83 = arith.constant 0 : index
    %c0_84 = arith.constant 0 : index
    %163 = vector.load %arg6[%c8, %c0_83, %c0_84] : memref<9x32x4xf32, #tpu.memory_space<vmem>>, vector<1x32x4xf32>
    %164 = vector.shape_cast %163 : vector<1x32x4xf32> to vector<32x4xf32>
    %cst_85 = arith.constant dense<0.000000e+00> : vector<32x256xf32>
    %165 = tpu.matmul %164, %162, %cst_85 {dimension_numbers = #tpu.dot_dimension_numbers<[1], [0], [0], [1], [0, 0, 1, 1], [], []>} : vector<32x4xf32>, vector<4x256xf32>, vector<32x256xf32> -> vector<32x256xf32>
    %166 = arith.addf %150, %165 : vector<32x256xf32>
    %cst_86 = arith.constant 0.000000e+00 : f32
    %167 = vector.broadcast %cst_86 : f32 to vector<32x128xf32>
    %c0_87 = arith.constant 0 : index
    %c0_88 = arith.constant 0 : index
    %168 = vector.load %arg11[%c0_87, %c0_88] : memref<32x512xf32, #tpu.memory_space<vmem>>, vector<32x128xf32>
    tpu.vector_store %arg11[%c0_87, %c0_88], %167 {strides = array<i32>} : memref<32x512xf32, #tpu.memory_space<vmem>>, vector<32x128xf32>,
    %cst_89 = arith.constant 0.000000e+00 : f32
    %169 = vector.broadcast %cst_89 : f32 to vector<32x128xf32>
    %c0_90 = arith.constant 0 : index
    %c384_91 = arith.constant 384 : index
    %170 = vector.load %arg11[%c0_90, %c384_91] : memref<32x512xf32, #tpu.memory_space<vmem>>, vector<32x128xf32>
    tpu.vector_store %arg11[%c0_90, %c384_91], %169 {strides = array<i32>} : memref<32x512xf32, #tpu.memory_space<vmem>>, vector<32x128xf32>,
    %c0_92 = arith.constant 0 : index
    %c128_93 = arith.constant 128 : index
    %171 = vector.load %arg11[%c0_92, %c128_93] : memref<32x512xf32, #tpu.memory_space<vmem>>, vector<32x256xf32>
    tpu.vector_store %arg11[%c0_92, %c128_93], %166 {strides = array<i32>} : memref<32x512xf32, #tpu.memory_space<vmem>>, vector<32x256xf32>,
    %cst_94 = arith.constant 0.000000e+00 : f32
    %172 = vector.broadcast %cst_94 : f32 to vector<32x256xf32>
    %c0_95 = arith.constant 0 : index
    %c64 = arith.constant 64 : index
    %173 = vector.load %arg11[%c0_95, %c64] : memref<32x512xf32, #tpu.memory_space<vmem>>, vector<32x256xf32>
    %c0_96 = arith.constant 0 : index
    %c0_97 = arith.constant 0 : index
    %c0_98 = arith.constant 0 : index
    %174 = vector.load %arg7[%c0_96, %c0_97, %c0_98] : memref<9x32x32xf32, #tpu.memory_space<vmem>>, vector<1x32x32xf32>
    %175 = vector.shape_cast %174 : vector<1x32x32xf32> to vector<32x32xf32>
    %cst_99 = arith.constant dense<0.000000e+00> : vector<32x256xf32>
    %176 = tpu.matmul %175, %173, %cst_99 {dimension_numbers = #tpu.dot_dimension_numbers<[1], [0], [0], [1], [0, 0, 1, 1], [], []>} : vector<32x32xf32>, vector<32x256xf32>, vector<32x256xf32> -> vector<32x256xf32>
    %177 = arith.addf %172, %176 : vector<32x256xf32>
    %c0_100 = arith.constant 0 : index
    %c80 = arith.constant 80 : index
    %178 = vector.load %arg11[%c0_100, %c80] : memref<32x512xf32, #tpu.memory_space<vmem>>, vector<32x256xf32>
    %c1_101 = arith.constant 1 : index
    %c0_102 = arith.constant 0 : index
    %c0_103 = arith.constant 0 : index
    %179 = vector.load %arg7[%c1_101, %c0_102, %c0_103] : memref<9x32x32xf32, #tpu.memory_space<vmem>>, vector<1x32x32xf32>
    %180 = vector.shape_cast %179 : vector<1x32x32xf32> to vector<32x32xf32>
    %cst_104 = arith.constant dense<0.000000e+00> : vector<32x256xf32>
    %181 = tpu.matmul %180, %178, %cst_104 {dimension_numbers = #tpu.dot_dimension_numbers<[1], [0], [0], [1], [0, 0, 1, 1], [], []>} : vector<32x32xf32>, vector<32x256xf32>, vector<32x256xf32> -> vector<32x256xf32>
    %182 = arith.addf %177, %181 : vector<32x256xf32>
    %c0_105 = arith.constant 0 : index
    %c96 = arith.constant 96 : index
    %183 = vector.load %arg11[%c0_105, %c96] : memref<32x512xf32, #tpu.memory_space<vmem>>, vector<32x256xf32>
    %c2_106 = arith.constant 2 : index
    %c0_107 = arith.constant 0 : index
    %c0_108 = arith.constant 0 : index
    %184 = vector.load %arg7[%c2_106, %c0_107, %c0_108] : memref<9x32x32xf32, #tpu.memory_space<vmem>>, vector<1x32x32xf32>
    %185 = vector.shape_cast %184 : vector<1x32x32xf32> to vector<32x32xf32>
    %cst_109 = arith.constant dense<0.000000e+00> : vector<32x256xf32>
    %186 = tpu.matmul %185, %183, %cst_109 {dimension_numbers = #tpu.dot_dimension_numbers<[1], [0], [0], [1], [0, 0, 1, 1], [], []>} : vector<32x32xf32>, vector<32x256xf32>, vector<32x256xf32> -> vector<32x256xf32>
    %187 = arith.addf %182, %186 : vector<32x256xf32>
    %c0_110 = arith.constant 0 : index
    %c112 = arith.constant 112 : index
    %188 = vector.load %arg11[%c0_110, %c112] : memref<32x512xf32, #tpu.memory_space<vmem>>, vector<32x256xf32>
    %c3_111 = arith.constant 3 : index
    %c0_112 = arith.constant 0 : index
    %c0_113 = arith.constant 0 : index
    %189 = vector.load %arg7[%c3_111, %c0_112, %c0_113] : memref<9x32x32xf32, #tpu.memory_space<vmem>>, vector<1x32x32xf32>
    %190 = vector.shape_cast %189 : vector<1x32x32xf32> to vector<32x32xf32>
    %cst_114 = arith.constant dense<0.000000e+00> : vector<32x256xf32>
    %191 = tpu.matmul %190, %188, %cst_114 {dimension_numbers = #tpu.dot_dimension_numbers<[1], [0], [0], [1], [0, 0, 1, 1], [], []>} : vector<32x32xf32>, vector<32x256xf32>, vector<32x256xf32> -> vector<32x256xf32>
    %192 = arith.addf %187, %191 : vector<32x256xf32>
    %c0_115 = arith.constant 0 : index
    %c128_116 = arith.constant 128 : index
    %193 = vector.load %arg11[%c0_115, %c128_116] : memref<32x512xf32, #tpu.memory_space<vmem>>, vector<32x256xf32>
    %c4_117 = arith.constant 4 : index
    %c0_118 = arith.constant 0 : index
    %c0_119 = arith.constant 0 : index
    %194 = vector.load %arg7[%c4_117, %c0_118, %c0_119] : memref<9x32x32xf32, #tpu.memory_space<vmem>>, vector<1x32x32xf32>
    %195 = vector.shape_cast %194 : vector<1x32x32xf32> to vector<32x32xf32>
    %cst_120 = arith.constant dense<0.000000e+00> : vector<32x256xf32>
    %196 = tpu.matmul %195, %193, %cst_120 {dimension_numbers = #tpu.dot_dimension_numbers<[1], [0], [0], [1], [0, 0, 1, 1], [], []>} : vector<32x32xf32>, vector<32x256xf32>, vector<32x256xf32> -> vector<32x256xf32>
    %197 = arith.addf %192, %196 : vector<32x256xf32>
    %c0_121 = arith.constant 0 : index
    %c144 = arith.constant 144 : index
    %198 = vector.load %arg11[%c0_121, %c144] : memref<32x512xf32, #tpu.memory_space<vmem>>, vector<32x256xf32>
    %c5_122 = arith.constant 5 : index
    %c0_123 = arith.constant 0 : index
    %c0_124 = arith.constant 0 : index
    %199 = vector.load %arg7[%c5_122, %c0_123, %c0_124] : memref<9x32x32xf32, #tpu.memory_space<vmem>>, vector<1x32x32xf32>
    %200 = vector.shape_cast %199 : vector<1x32x32xf32> to vector<32x32xf32>
    %cst_125 = arith.constant dense<0.000000e+00> : vector<32x256xf32>
    %201 = tpu.matmul %200, %198, %cst_125 {dimension_numbers = #tpu.dot_dimension_numbers<[1], [0], [0], [1], [0, 0, 1, 1], [], []>} : vector<32x32xf32>, vector<32x256xf32>, vector<32x256xf32> -> vector<32x256xf32>
    %202 = arith.addf %197, %201 : vector<32x256xf32>
    %c0_126 = arith.constant 0 : index
    %c160 = arith.constant 160 : index
    %203 = vector.load %arg11[%c0_126, %c160] : memref<32x512xf32, #tpu.memory_space<vmem>>, vector<32x256xf32>
    %c6_127 = arith.constant 6 : index
    %c0_128 = arith.constant 0 : index
    %c0_129 = arith.constant 0 : index
    %204 = vector.load %arg7[%c6_127, %c0_128, %c0_129] : memref<9x32x32xf32, #tpu.memory_space<vmem>>, vector<1x32x32xf32>
    %205 = vector.shape_cast %204 : vector<1x32x32xf32> to vector<32x32xf32>
    %cst_130 = arith.constant dense<0.000000e+00> : vector<32x256xf32>
    %206 = tpu.matmul %205, %203, %cst_130 {dimension_numbers = #tpu.dot_dimension_numbers<[1], [0], [0], [1], [0, 0, 1, 1], [], []>} : vector<32x32xf32>, vector<32x256xf32>, vector<32x256xf32> -> vector<32x256xf32>
    %207 = arith.addf %202, %206 : vector<32x256xf32>
    %c0_131 = arith.constant 0 : index
    %c176 = arith.constant 176 : index
    %208 = vector.load %arg11[%c0_131, %c176] : memref<32x512xf32, #tpu.memory_space<vmem>>, vector<32x256xf32>
    %c7_132 = arith.constant 7 : index
    %c0_133 = arith.constant 0 : index
    %c0_134 = arith.constant 0 : index
    %209 = vector.load %arg7[%c7_132, %c0_133, %c0_134] : memref<9x32x32xf32, #tpu.memory_space<vmem>>, vector<1x32x32xf32>
    %210 = vector.shape_cast %209 : vector<1x32x32xf32> to vector<32x32xf32>
    %cst_135 = arith.constant dense<0.000000e+00> : vector<32x256xf32>
    %211 = tpu.matmul %210, %208, %cst_135 {dimension_numbers = #tpu.dot_dimension_numbers<[1], [0], [0], [1], [0, 0, 1, 1], [], []>} : vector<32x32xf32>, vector<32x256xf32>, vector<32x256xf32> -> vector<32x256xf32>
    %212 = arith.addf %207, %211 : vector<32x256xf32>
    %c0_136 = arith.constant 0 : index
    %c192 = arith.constant 192 : index
    %213 = vector.load %arg11[%c0_136, %c192] : memref<32x512xf32, #tpu.memory_space<vmem>>, vector<32x256xf32>
    %c8_137 = arith.constant 8 : index
    %c0_138 = arith.constant 0 : index
    %c0_139 = arith.constant 0 : index
    %214 = vector.load %arg7[%c8_137, %c0_138, %c0_139] : memref<9x32x32xf32, #tpu.memory_space<vmem>>, vector<1x32x32xf32>
    %215 = vector.shape_cast %214 : vector<1x32x32xf32> to vector<32x32xf32>
    %cst_140 = arith.constant dense<0.000000e+00> : vector<32x256xf32>
    %216 = tpu.matmul %215, %213, %cst_140 {dimension_numbers = #tpu.dot_dimension_numbers<[1], [0], [0], [1], [0, 0, 1, 1], [], []>} : vector<32x32xf32>, vector<32x256xf32>, vector<32x256xf32> -> vector<32x256xf32>
    %217 = arith.addf %212, %216 : vector<32x256xf32>
    %c0_141 = arith.constant 0 : index
    %c0_142 = arith.constant 0 : index
    %218 = vector.load %arg8[%c0_141, %c0_142] : memref<32x1xf32, #tpu.memory_space<vmem>>, vector<32x1xf32>
    %219 = vector.broadcast %218 : vector<32x1xf32> to vector<32x256xf32>
    %220 = arith.addf %217, %219 : vector<32x256xf32>
    %cst_143 = arith.constant 0.000000e+00 : f32
    %221 = vector.broadcast %cst_143 : f32 to vector<32x256xf32>
    %222 = arith.maximumf %220, %221 : vector<32x256xf32>
    %c0_144 = arith.constant 0 : index
    %c4_145 = arith.constant 4 : index
    %c0_146 = arith.constant 0 : index
    %223 = vector.load %arg9[%c0_144, %c4_145, %c0_146] : memref<1x40x256xf32, #tpu.memory_space<vmem>>, vector<1x32x256xf32>
    %224 = vector.shape_cast %223 : vector<1x32x256xf32> to vector<32x256xf32>
    %225 = vector.shape_cast %222 : vector<32x256xf32> to vector<1x32x256xf32>
    tpu.vector_store %arg9[%c0_144, %c4_145, %c0_146], %225 {strides = array<i32>} : memref<1x40x256xf32, #tpu.memory_space<vmem>>, vector<1x32x256xf32>,
    return
  }
  func.func @transform_0(%arg0: i32) -> (i32, i32, i32) {
    %c0_i32 = arith.constant 0 : i32
    %c0_i32_0 = arith.constant 0 : i32
    %c0_i32_1 = arith.constant 0 : i32
    return %arg0, %c0_i32, %c0_i32_0 : i32, i32, i32
  }
  func.func @transform_1(%arg0: i32) -> (i32, i32) {
    %c0_i32 = arith.constant 0 : i32
    %c0_i32_0 = arith.constant 0 : i32
    %c0_i32_1 = arith.constant 0 : i32
    return %c0_i32, %c0_i32_0 : i32, i32
  }
  func.func @transform_2(%arg0: i32) -> (i32, i32) {
    %c0_i32 = arith.constant 0 : i32
    %c0_i32_0 = arith.constant 0 : i32
    %c0_i32_1 = arith.constant 0 : i32
    return %c0_i32, %c0_i32_0 : i32, i32
  }
  func.func @transform_3(%arg0: i32) -> (i32, i32) {
    %c0_i32 = arith.constant 0 : i32
    %c0_i32_0 = arith.constant 0 : i32
    %c0_i32_1 = arith.constant 0 : i32
    return %c0_i32, %c0_i32_0 : i32, i32
  }
  func.func @transform_4(%arg0: i32) -> (i32, i32) {
    %c0_i32 = arith.constant 0 : i32
    %c0_i32_0 = arith.constant 0 : i32
    %c0_i32_1 = arith.constant 0 : i32
    return %c0_i32, %c0_i32_0 : i32, i32
  }
  func.func @transform_5(%arg0: i32) -> (i32, i32, i32) {
    %c0_i32 = arith.constant 0 : i32
    %c0_i32_0 = arith.constant 0 : i32
    %c0_i32_1 = arith.constant 0 : i32
    %c0_i32_2 = arith.constant 0 : i32
    return %c0_i32, %c0_i32_0, %c0_i32_1 : i32, i32, i32
  }
  func.func @transform_6(%arg0: i32) -> (i32, i32, i32) {
    %c0_i32 = arith.constant 0 : i32
    %c0_i32_0 = arith.constant 0 : i32
    %c0_i32_1 = arith.constant 0 : i32
    %c0_i32_2 = arith.constant 0 : i32
    return %c0_i32, %c0_i32_0, %c0_i32_1 : i32, i32, i32
  }
  func.func @transform_7(%arg0: i32) -> (i32, i32) {
    %c0_i32 = arith.constant 0 : i32
    %c0_i32_0 = arith.constant 0 : i32
    %c0_i32_1 = arith.constant 0 : i32
    return %c0_i32, %c0_i32_0 : i32, i32
  }
  func.func @transform_8(%arg0: i32) -> (i32, i32, i32) {
    %c0_i32 = arith.constant 0 : i32
    %c0_i32_0 = arith.constant 0 : i32
    %c0_i32_1 = arith.constant 0 : i32
    return %arg0, %c0_i32, %c0_i32_0 : i32, i32, i32
  }
}

</mosaic_0001>

<bundles_post_ra>
// kernel: tile.9
= control target key start
LH: loop header
LB: loop body
LE: loop exit
PB: predicated region body
PF: predicated region fallthrough
CT: control target
= control target key end

     0   :  { %s7_s6 = smov 3  ;;  %s21_s9 = smov 3  ;;  %vm4_vm0 = vcmask 130048   ;;  %vm11_vm1 = vcmask 1048448   ;;  %vm18_vm2 = vcmask 917248   ;;  %vm25_vm3 = vcmask 786048   ;;  %s129_s0 = inlined_call_operand.vmem [shape: s32[16,16], index: 0, kind: input, shape index: {}]   ;;  %s130_s1 = inlined_call_operand.vmem [shape: s32[1,256], index: 1, kind: output, shape index: {}]  }
   0x1   :  { %v67_v0 = vld [vmem:[%s129_s0 + $0x7] ss:$8 sm:%s7_s6]   ;;  %s82_s10 = smov 112   ;;  %v69_v1 = vld [vmem:[%s129_s0 + $0x5] ss:$8 sm:%s21_s9]   ;;  %s83_s13 = smov 80  }
   0x2   :  { %9 = vrot.lane.b32.xlu0 %v67_v0, %s82_s10  ;;  %23 = vrot.lane.b32.xlu1 %v69_v1, %s83_s13  ;;  %s14_s14 = smov 3  ;;  %s28_s15 = smov 3  ;;  %vm32_vm4 = vcmask 654848   ;;  %vm39_vm5 = vcmask 523648   ;;  %vm46_vm6 = vcmask 392448   ;;  %vm53_vm7 = vcmask 261248  }
   0x3   :  { %s35_s16 = smov 3  ;;  %v68_v3 = vld [vmem:[%s129_s0 + $0x6] ss:$8 sm:%s14_s14]   ;;  %s84_s21 = smov 48   ;;  %v70_v4 = vld [vmem:[%s129_s0 + $0x4] ss:$8 sm:%s28_s15]  }
   0x4   :  { %v71_v2 = vld [vmem:[%s129_s0 + $0x3] ss:$8 sm:%s35_s16]   ;;  %s42_s24 = smov 3  ;;  %s85_s25 = smov 96  }
   0x5   :  { %37 = vrot.lane.b32.xlu2 %v71_v2, %s84_s21  ;;  %s86_s26 = smov 64   ;;  %s49_s27 = smov 3  ;;  %v72_v5 = vld [vmem:[%s129_s0 + $0x2] ss:$8 sm:%s42_s24]  }
   0x6   :  { %v73_v6 = vld [vmem:[%s129_s0 + $0x1] ss:$8 sm:%s49_s27]   ;;  %s87_s3 = smov 32   ;;  %s88_s4 = smov 16  }
   0x7   :  { %s2_s5 = smov 3 }
   0x8   :  { %v3_v7 = vld [vmem:[%s129_s0] ss:$8 sm:%s2_s5]  }
   0x9   :  { %5 = vst.msk [vmem:[#allocation0] ss:$8 sm:$0x3] %vm4_vm0, %v3_v7  }
   0xa   :  { %16 = vrot.lane.b32.xlu0 %v68_v3, %s85_s25  ;;  %30 = vrot.lane.b32.xlu1 %v70_v4, %s86_s26 }
   0xd   :  { %44 = vrot.lane.b32.xlu2 %v72_v5, %s87_s3 }
  0x12   :  { %51 = vrot.lane.b32.xlu0 %v73_v6, %s88_s4 }
  0x5f   :  { %v38_v8 = vpop.permute.xlu2 %37  }
  0x67   :  { %v45_v9 = vpop.permute.xlu2 %44  }
  0x74   :  { %v10_v10 = vpop.permute.xlu0 %9   ;;  %v24_v11 = vpop.permute.xlu1 %23  }
  0x75   :  { %12 = vst.msk [vmem:[#allocation0] ss:$8 sm:$0x3] %vm11_vm1, %v10_v10  }
  0x7c   :  { %v17_v12 = vpop.permute.xlu0 %16   ;;  %v31_v13 = vpop.permute.xlu1 %30  }
  0x7d   :  { %19 = vst.msk [vmem:[#allocation0] ss:$8 sm:$0x3] %vm18_vm2, %v17_v12  }
  0x7e   :  { %26 = vst.msk [vmem:[#allocation0] ss:$8 sm:$0x3] %vm25_vm3, %v24_v11  }
  0x7f   :  { %33 = vst.msk [vmem:[#allocation0] ss:$8 sm:$0x3] %vm32_vm4, %v31_v13  }
  0x80   :  { %40 = vst.msk [vmem:[#allocation0] ss:$8 sm:$0x3] %vm39_vm5, %v38_v8  }
  0x81   :  { %47 = vst.msk [vmem:[#allocation0] ss:$8 sm:$0x3] %vm46_vm6, %v45_v9  }
  0x84   :  { %v52_v14 = vpop.permute.xlu0 %51  }
  0x85   :  { %54 = vst.msk [vmem:[#allocation0] ss:$8 sm:$0x3] %vm53_vm7, %v52_v14  }
  0x8c   :  { %v57_v15 = vld [vmem:[#allocation0] sm:$0x1]  ;;  %v62_v16 = vld [vmem:[#allocation0 + $0x8] sm:$0x1] }
  0x8d   :  { %60 = vst [vmem:[%s130_s1] sm:$0x1] %v57_v15 }
  0x8e   :  { %74 = vst [vmem:[%s130_s1 + $0x1] sm:$0x1] %v62_v16 }

// kernel: conpy_forward.1
= control target key start
LH: loop header
LB: loop body
LE: loop exit
PB: predicated region body
PF: predicated region fallthrough
CT: control target
= control target key end

     0   :  { %s3288_s27 = smov 0   ;;  %s4127_s0 = inlined_call_operand.vmem [shape: f32[2,4,256], index: 0, kind: input, shape index: {}]   ;;  %s4128_s1 = inlined_call_operand.vmem [shape: s32[1,256], index: 1, kind: input, shape index: {}]   ;;  %s4129_s2 = inlined_call_operand.vmem [shape: f32[8,4], index: 2, kind: input, shape index: {}]   ;;  %s4130_s3 = inlined_call_operand.vmem [shape: f32[4,1], index: 3, kind: input, shape index: {}]   ;;  %s4131_s4 = inlined_call_operand.vmem [shape: f32[4,1], index: 4, kind: input, shape index: {}]   ;;  %s4132_s5 = inlined_call_operand.vmem [shape: f32[9,32,4], index: 5, kind: input, shape index: {}]   ;;  %s4133_s6 = inlined_call_operand.vmem [shape: f32[9,32,32], index: 6, kind: input, shape index: {}]   ;;  %s4134_s7 = inlined_call_operand.vmem [shape: f32[32,1], index: 7, kind: input, shape index: {}]   ;;  %s4135_s8 = inlined_call_operand.vmem [shape: f32[2,40,256], index: 8, kind: output, shape index: {}]  }
   0x1 LB: > { %s2704_s28 = sadd.s32 4294967295, %s3223_s27   ;;  %p2708_p0 = scmp.ge.s32.totalorder %s3223_s27, 1  ;;  %s3223_s27 = sphi %s3288_s27, %s18_s27  }
   0x2   : > { %p262_p1 = scmp.lt.s32.totalorder %s3223_s27, 3 }
   0x4   : > { %p263_p2 = pnand %p2708_p0, %p262_p1 }
   0x6   : > { %266 = sbr.rel (%p263_p2) target bundleno = 869 (0x365), region = 52 }
   0xb   : > { %p296_p3 = scmp.lt.s32.totalorder %s2704_s28, 1  ;;  %v4136_v0 = vmov 0.0   ;;  %s3226_s11 = smov 3   ;;  %v3234_v38 = vmov 0   ;;  %vm317_vm0 = vcmask 1043456   ;;  %v308_v39 = vld [vmem:[%s4129_s2] sm:$0xff] }
   0xc   : > { %401 = vst [vmem:[#allocation2] sm:$0xf] %v4136_v0  ;;  %s3227_s12 = smov 2   ;;  %s3228_s13 = smov 4   ;;  %2972 = vset.pattern.permute.xlu0 %v3234_v38  ;;  %3213 = vset.pattern.permute.xlu2 %v3234_v38  ;;  %vm313_vm1 = vcmask 31744   ;;  %vm653_vm10 = vcmask 15360  }
   0xd   : > { %s4158_s28 = smov (!%p296_p3, %s2704_s28), 1  ;;  %402 = vst [vmem:[#allocation2 + $0xc] sm:$0xf] %v4136_v0  ;;  %s3229_s14 = smov 1   ;;  %3214 = vset.pattern.permute.xlu1 %v3234_v38  ;;  %v3336_v41 = vld [vmem:[%s4128_s1] sm:$0x3] }
   0xe   : > { %s2944_s29 = sshll.u32 %s4158_s28, 3  ;;  %s3230_s15 = smov 126   ;;  %v441_v42 = vadd.s32 4294967293, %v3336_v41  ;;  %v630_v43 = vadd.s32 4294967294, %v3336_v41  ;;  %v406_v46 = vadd.s32 4294967292, %v3336_v41  ;;  %vm464_vm13 = vcmask 23552  }
   0xf   : > { %s300_s10 = scalar_lea.vmem %s4127_s0, %s2944_s29  ;;  %s3231_s16 = smov 127   ;;  %v2741_v57 = vld [vmem:[%s4132_s5 + $0x48] sm:$0xff] }
  0x10   : > { %v3304_v1 = vld [vmem:[%s300_s10] sm:$0xff]  ;;  %s3232_s17 = smov 124   ;;  %s3233_s18 = smov 125   ;;  %vm442_vm2 = vcmp.ge.s32.totalorder %v441_v42, 0  ;;  %vm443_vm3 = vcmp.lt.s32.totalorder %v441_v42, 16  ;;  %vm631_vm4 = vcmp.ge.s32.totalorder %v630_v43, 0 }
  0x11   : > { %403 = vst [vmem:[#allocation2 + $0x4] sm:$0xff] %v3304_v1  ;;  %vm632_vm5 = vcmp.lt.s32.totalorder %v630_v43, 16  ;;  %vm444_vm6 = vmand %vm442_vm2, %vm443_vm3  ;;  %vm407_vm8 = vcmp.ge.s32.totalorder %v406_v46, 0  ;;  %vm408_vm9 = vcmp.lt.s32.totalorder %v406_v46, 16  ;;  %v438_v43 = vld [vmem:[%s4132_s5 + $0x18] sm:$0xff]  ;;  %s2945_s29 = smul.u32 80, %s4158_s28 }
  0x12   : > { %310 = vst [vmem:[#allocation1] ss:$2 sm:$0xff] %v3304_v1  ;;  %vm633_vm7 = vmand %vm631_vm4, %vm632_vm5  ;;  %v445_v47 = vsel %vm444_vm6, 1, %v3234_v38  ;;  %s3235_s20 = smov 48   ;;  %s3236_s21 = smov 64  }
  0x13   : > { %v634_v49 = vsel %vm633_vm7, 1, %v3234_v38  ;;  %v446_v50 = vperm.slane %v445_v47, 0  ;;  %v447_v51 = vperm.slane %v445_v47, 1  ;;  %vm409_vm11 = vmand %vm407_vm8, %vm408_vm9  ;;  %vm774_vm8 = vcmask 7168   ;;  %s3562_s10 = scalar_lea.vmem %s4135_s8, %s2945_s29  ;;  %s3237_s22 = smov 32  }
  0x14   : > { %v963_v18 = vld [vmem:[#allocation2 + $0xc] sm:$0xf]  ;;  %v635_v52 = vperm.slane %v634_v49, 0  ;;  %v636_v53 = vperm.slane %v634_v49, 1  ;;  %v410_v62 = vsel %vm409_vm11, 1, %v3234_v38  ;;  %s3238_s23 = smov 16  }
  0x15   : > { %v1084_v22 = vld [vmem:[#allocation2 + $0xc] sm:$0xf]  ;;  %vm3343_vm12 = vcmp.eq.s32.totalorder %v446_v50, 1  ;;  %vm3347_vm14 = vcmp.eq.s32.totalorder %v447_v51, 1  ;;  %s3239_s24 = smov 112   ;;  %s3240_s25 = smov 96  }
  0x16   : > { %v1205_v26 = vld [vmem:[#allocation2 + $0xc] sm:$0xf]  ;;  %vm3351_vm15 = vcmp.eq.s32.totalorder %v635_v52, 1  ;;  %vm3355_vm2 = vcmp.eq.s32.totalorder %v636_v53, 1  ;;  %s3241_s26 = smov 80  }
  0x17   : > { %v1326_v30 = vld [vmem:[#allocation2 + $0xc] sm:$0xf] }
  0x18   : > { %v405_v2 = vld [vmem:[#allocation2 + $0x8] sm:$0xf]  ;;  %v404_v3 = vld [vmem:[#allocation2] sm:$0xff] }
  0x19   : > { %419 = vst [vmem:[#allocation1 + $0x10] ss:$2 sm:$0xff] %v405_v2  ;;  %v3308_v4 = vld.sshfl [vmem:[#allocation1] sm:$0xff pattern:$0x75316420] }
  0x1a   : > { %v3310_v5 = vld.sshfl [vmem:[#allocation1 + $0x8] sm:$0xff pattern:$0x75316420]  ;;  %v440_v6 = vld [vmem:[#allocation2 + $0x8] sm:$0xf]  ;;  %2712 = vmatpush.msk.msra.mxu0 %vm317_vm0, %v3308_v4 }
  0x1b   : > { %417 = vst [vmem:[#allocation1] ss:$2 sm:$0xff] %v404_v3  ;;  %v629_v10 = vld [vmem:[#allocation2 + $0x8] sm:$0xf]  ;;  %2714 = vmatpush.msk.msra.mxu1 %vm317_vm0, %v3310_v5  ;;  %2713 = vmatmul.msk.f32.vlgmr.msra.gmra.mxu0 %vm313_vm1, %v308_v39 }
  0x1c   : > { %v750_v14 = vld [vmem:[#allocation2 + $0x8] sm:$0xf]  ;;  %2715 = vmatmul.msk.f32.vlgmr.msra.gmra.mxu1 %vm313_vm1, %v308_v39 }
  0x20   : > { %v422_v7 = vld.sshfl [vmem:[#allocation1 + $0x10] sm:$0xff pattern:$0x75316420] }
  0x21   : > { %454 = vst [vmem:[#allocation1 + $0x10] ss:$2 sm:$0xff] %v440_v6 }
  0x22   : > { %v420_v8 = vld.sshfl [vmem:[#allocation1] sm:$0xff pattern:$0x75316420]  ;;  %v421_v9 = vld.sshfl [vmem:[#allocation1 + $0x8] sm:$0xff pattern:$0x75316420] }
  0x23   : > { %452 = vst [vmem:[#allocation1] ss:$2 sm:$0xff] %v404_v3 }
  0x28   : > { %v457_v11 = vld.sshfl [vmem:[#allocation1 + $0x10] sm:$0xff pattern:$0x75316420] }
  0x29   : > { %462 = vrot.lane.b32.xlu1 %v457_v11, %s3226_s11  ;;  %643 = vst [vmem:[#allocation1 + $0x10] ss:$2 sm:$0xff] %v629_v10  ;;  %v751_v10 = vadd.s32 4294967295, %v3336_v41  ;;  %v362_v11 = vld [vmem:[%s4130_s3] sm:$0xf] }
  0x2a   : > { %v455_v12 = vld.sshfl [vmem:[#allocation1] sm:$0xff pattern:$0x75316420]  ;;  %v456_v13 = vld.sshfl [vmem:[#allocation1 + $0x8] sm:$0xff pattern:$0x75316420] }
  0x2b   : > { %458 = vrot.lane.b32.xlu0 %v455_v12, %s3226_s11  ;;  %641 = vst [vmem:[#allocation1] ss:$2 sm:$0xff] %v404_v3  ;;  %vm752_vm3 = vcmp.ge.s32.totalorder %v751_v10, 0  ;;  %vm753_vm4 = vcmp.lt.s32.totalorder %v751_v10, 16  ;;  %v2757_v10 = vld [vmem:[%s4132_s5 + $0x78] sm:$0xff] }
  0x2c   : > { %vm754_vm5 = vmand %vm752_vm3, %vm753_vm4 }
  0x30   : > { %v646_v15 = vld.sshfl [vmem:[#allocation1 + $0x10] sm:$0xff pattern:$0x75316420] }
  0x31   : > { %764 = vst [vmem:[#allocation1 + $0x10] ss:$2 sm:$0xff] %v750_v14 }
  0x32   : > { %v644_v16 = vld.sshfl [vmem:[#allocation1] sm:$0xff pattern:$0x75316420]  ;;  %v645_v17 = vld.sshfl [vmem:[#allocation1 + $0x8] sm:$0xff pattern:$0x75316420] }
  0x33   : > { %460 = vrot.lane.b32.xlu0 %v456_v13, %s3226_s11  ;;  %647 = vrot.lane.b32.xlu1 %v644_v16, %s3227_s12  ;;  %762 = vst [vmem:[#allocation1] ss:$2 sm:$0xff] %v404_v3  ;;  %v2716_v3 = vld [vmem:[%s4132_s5 + $0x20] sm:$0xff] }
  0x34   : > { %649 = vrot.lane.b32.xlu2 %v645_v17, %s3227_s12 }
  0x38   : > { %v767_v19 = vld.sshfl [vmem:[#allocation1 + $0x10] sm:$0xff pattern:$0x75316420] }
  0x39   : > { %977 = vst [vmem:[#allocation1 + $0x10] ss:$2 sm:$0xff] %v963_v18  ;;  %v2717_v18 = vld [vmem:[%s4132_s5 + $0x28] sm:$0xff] }
  0x3a   : > { %v766_v20 = vld.sshfl [vmem:[#allocation1 + $0x8] sm:$0xff pattern:$0x75316420]  ;;  %v765_v21 = vld.sshfl [vmem:[#allocation1] sm:$0xff pattern:$0x75316420] }
  0x3b   : > { %423 = vrot.lane.b32.xlu0 %v420_v8, %s3228_s13  ;;  %425 = vrot.lane.b32.xlu1 %v421_v9, %s3228_s13  ;;  %877 = vst [vmem:[#allocation1] ss:$2 sm:$0xff] %v3304_v1  ;;  %v411_v8 = vperm.slane %v410_v62, 0  ;;  %v412_v9 = vperm.slane %v410_v62, 1 }
  0x3c   : > { %651 = vrot.lane.b32.xlu2 %v646_v15, %s3227_s12  ;;  %v755_v15 = vsel %vm754_vm5, 1, %v3234_v38 }
  0x3d   : > { %vm413_vm6 = vcmp.eq.s32.totalorder %v411_v8, 1  ;;  %vm414_vm7 = vcmp.eq.s32.totalorder %v412_v9, 1  ;;  %v2768_v8 = vld [vmem:[%s4132_s5 + $0x80] sm:$0xff] }
  0x40   : > { %v980_v23 = vld.sshfl [vmem:[#allocation1 + $0x10] sm:$0xff pattern:$0x75316420] }
  0x41   : > { %1098 = vst [vmem:[#allocation1 + $0x10] ss:$2 sm:$0xff] %v1084_v22  ;;  %v757_v22 = vperm.slane %v755_v15, 1 }
  0x42   : > { %v3313_v24 = vld.sshfl [vmem:[#allocation1] sm:$0xff pattern:$0x75316420]  ;;  %v3315_v25 = vld.sshfl [vmem:[#allocation1 + $0x8] sm:$0xff pattern:$0x75316420] }
  0x43   : > { %770 = vrot.lane.b32.xlu1 %v766_v20, %s3229_s14  ;;  %768 = vrot.lane.b32.xlu0 %v765_v21, %s3229_s14  ;;  %975 = vst [vmem:[#allocation1] ss:$2 sm:$0xff] %v3304_v1  ;;  %v435_v21 = vld [vmem:[%s4132_s5] sm:$0xff]  ;;  %vm759_vm9 = vcmp.eq.s32.totalorder %v757_v22, 1 }
  0x44   : > { %427 = vrot.lane.b32.xlu2 %v422_v7, %s3228_s13 }
  0x48   : > { %v1101_v27 = vld.sshfl [vmem:[#allocation1 + $0x10] sm:$0xff pattern:$0x75316420] }
  0x49   : > { %1219 = vst [vmem:[#allocation1 + $0x10] ss:$2 sm:$0xff] %v1205_v26 }
  0x4a   : > { %v978_v28 = vld.sshfl [vmem:[#allocation1] sm:$0xff pattern:$0x75316420]  ;;  %v979_v29 = vld.sshfl [vmem:[#allocation1 + $0x8] sm:$0xff pattern:$0x75316420] }
  0x4b   : > { %1096 = vst [vmem:[#allocation1] ss:$2 sm:$0xff] %v3304_v1 }
  0x4c   : > { %772 = vrot.lane.b32.xlu2 %v767_v19, %s3229_s14 }
  0x50   : > { %v1222_v31 = vld.sshfl [vmem:[#allocation1 + $0x10] sm:$0xff pattern:$0x75316420] }
  0x51   : > { %1340 = vst [vmem:[#allocation1 + $0x10] ss:$2 sm:$0xff] %v1326_v30  ;;  %v436_v30 = vld [vmem:[%s4132_s5 + $0x8] sm:$0xff] }
  0x52   : > { %v1100_v32 = vld.sshfl [vmem:[#allocation1 + $0x8] sm:$0xff pattern:$0x75316420]  ;;  %v1099_v33 = vld.sshfl [vmem:[#allocation1] sm:$0xff pattern:$0x75316420] }
  0x53   : > { %1104 = vrot.lane.b32.xlu1 %v1100_v32, %s3230_s15  ;;  %1102 = vrot.lane.b32.xlu0 %v1099_v33, %s3230_s15  ;;  %1217 = vst [vmem:[#allocation1] ss:$2 sm:$0xff] %v3304_v1  ;;  %v2719_v33 = vld [vmem:[%s4132_s5 + $0x38] sm:$0xff] }
  0x54   : > { %1106 = vrot.lane.b32.xlu2 %v1101_v27, %s3230_s15  ;;  %v2718_v27 = vld [vmem:[%s4132_s5 + $0x30] sm:$0xff] }
  0x58   : > { %v1343_v40 = vld.sshfl [vmem:[#allocation1 + $0x10] sm:$0xff pattern:$0x75316420] }
  0x5a   : > { %v1220_v34 = vld.sshfl [vmem:[#allocation1] sm:$0xff pattern:$0x75316420]  ;;  %v1221_v35 = vld.sshfl [vmem:[#allocation1 + $0x8] sm:$0xff pattern:$0x75316420] }
  0x5b   : > { %1338 = vst [vmem:[#allocation1] ss:$2 sm:$0xff] %v3304_v1  ;;  %983 = vrot.lane.b32.xlu1 %v979_v29, %s3231_s16  ;;  %981 = vrot.lane.b32.xlu0 %v978_v28, %s3231_s16 }
  0x5c   : > { %985 = vrot.lane.b32.xlu2 %v980_v23, %s3231_s16  ;;  %v756_v23 = vperm.slane %v755_v15, 0  ;;  %v1206_v15 = vadd.s32 3, %v3336_v41 }
  0x62   : > { %v1342_v36 = vld.sshfl [vmem:[#allocation1 + $0x8] sm:$0xff pattern:$0x75316420]  ;;  %v1341_v37 = vld.sshfl [vmem:[#allocation1] sm:$0xff pattern:$0x75316420] }
  0x63   : > { %1346 = vrot.lane.b32.xlu1 %v1342_v36, %s3232_s17  ;;  %1344 = vrot.lane.b32.xlu0 %v1341_v37, %s3232_s17  ;;  %v1085_v36 = vadd.s32 2, %v3336_v41 }
  0x64   : > { %1348 = vrot.lane.b32.xlu2 %v1343_v40, %s3232_s17  ;;  %v2740_v40 = vld [vmem:[%s4132_s5 + $0x40] sm:$0xff] }
  0x65   : > { %vm1086_vm11 = vcmp.ge.s32.totalorder %v1085_v36, 0 }
  0x6b   : > { %1225 = vrot.lane.b32.xlu1 %v1221_v35, %s3233_s18  ;;  %1223 = vrot.lane.b32.xlu0 %v1220_v34, %s3233_s18  ;;  %v437_v34 = vld [vmem:[%s4132_s5 + $0x10] sm:$0xff] }
  0x6c   : > { %1227 = vrot.lane.b32.xlu2 %v1222_v31, %s3233_s18 }
  0x73   : > { %365 = vperm.xlu0 %2972, %v362_v11  }
  0x8e   : > { %v650_v44 = vpop.permute.xlu2 %649 }
  0x96   : > { %v652_v54 = vpop.permute.xlu2 %651 }
  0x97   : > { %v655_v56 = vsel %vm653_vm10, %v650_v44, %v652_v54 }
  0x98   : > { %v659_v7 = vsel %vm3355_vm2, %v655_v56, 0.0 }
  0x9b   : > { %v463_v45 = vpop.permute.xlu1 %462 }
  0x9d   : > { %v459_v48 = vpop.permute.xlu0 %458 }
  0x9e   : > { %v428_v12 = vpop.permute.xlu2 %427 }
  0xa5   : > { %v461_v60 = vpop.permute.xlu0 %460  ;;  %v648_v61 = vpop.permute.xlu1 %647 }
  0xa6   : > { %v654_v63 = vsel %vm653_vm10, %v648_v61, %v650_v44  ;;  %v465_v1 = vsel %vm464_vm13, %v459_v48, %v461_v60  ;;  %v466_v2 = vsel %vm464_vm13, %v461_v60, %v463_v45  ;;  %vm758_vm10 = vcmp.eq.s32.totalorder %v756_v23, 1  ;;  %v2754_v60 = vld [vmem:[%s4132_s5 + $0x60] sm:$0xff] }
  0xa7   : > { %v469_v4 = vsel %vm3343_vm12, %v465_v1, 0.0  ;;  %v470_v5 = vsel %vm3347_vm14, %v466_v2, 0.0  ;;  %v658_v6 = vsel %vm3351_vm15, %v654_v63, 0.0  ;;  %vm1087_vm12 = vcmp.lt.s32.totalorder %v1085_v36, 16  ;;  %v2742_v63 = vld [vmem:[%s4132_s5 + $0x50] sm:$0xff]  ;;  %v2755_v1 = vld [vmem:[%s4132_s5 + $0x68] sm:$0xff] }
  0xa8   : > { %2720 = vmatpush.msk.msra.mxu2 %vm317_vm0, %v469_v4  ;;  %2725 = vmatpush.msk.msra.mxu3 %vm317_vm0, %v470_v5  ;;  %vm1108_vm13 = vcmask 1031168   ;;  %vm1088_vm14 = vmand %vm1086_vm11, %vm1087_vm12  ;;  %v964_v48 = vadd.s32 1, %v3336_v41  ;;  %v2743_v2 = vld [vmem:[%s4132_s5 + $0x58] sm:$0xff]  ;;  %v1327_v4 = vadd.s32 4, %v3336_v41  ;;  %vm1350_vm11 = vcmask 1014784   ;;  %v2798_v36 = vld [vmem:[%s4132_s5 + $0xd0] sm:$0xff] }
  0xa9   : > { %2721 = vmatmul.msk.f32.vlgmr.msra.gmra.mxu2 %vm313_vm1, %v2716_v3  ;;  %2726 = vmatmul.msk.f32.vlgmr.msra.gmra.mxu3 %vm313_vm1, %v2716_v3  ;;  %v1089_v42 = vsel %vm1088_vm14, 1, %v3234_v38  ;;  %v2756_v3 = vld [vmem:[%s4132_s5 + $0x70] sm:$0xff] }
  0xaa   : > { %2744 = vmatpush.msk.msrb.mxu2 %vm317_vm0, %v658_v6  ;;  %2749 = vmatpush.msk.msrb.mxu3 %vm317_vm0, %v659_v7  ;;  %v1091_v44 = vperm.slane %v1089_v42, 1  ;;  %v1090_v46 = vperm.slane %v1089_v42, 0  ;;  %vm965_vm3 = vcmp.ge.s32.totalorder %v964_v48, 0  ;;  %vm966_vm4 = vcmp.lt.s32.totalorder %v964_v48, 16  ;;  %v339_v42 = vpop.f32.mrf.mxu0 }
  0xab   : > { %vm967_vm5 = vmand %vm965_vm3, %vm966_vm4  ;;  %vm1229_vm4 = vcmask 1022976  }
  0xac   : > { %2772 = vmatpush.msk.msra.mxu2 %vm317_vm0, %v3313_v24  ;;  %2777 = vmatpush.msk.msra.mxu3 %vm317_vm0, %v3315_v25  ;;  %v773_v24 = vpop.permute.xlu2 %772  ;;  %vm1093_vm15 = vcmp.eq.s32.totalorder %v1091_v44, 1  ;;  %vm1092_vm2 = vcmp.eq.s32.totalorder %v1090_v46, 1  ;;  %v968_v52 = vsel %vm967_vm5, 1, %v3234_v38 }
  0xad   : > { %v424_v13 = vpop.permute.xlu0 %423  ;;  %v426_v14 = vpop.permute.xlu1 %425  ;;  %v970_v53 = vperm.slane %v968_v52, 1  ;;  %v969_v55 = vperm.slane %v968_v52, 0  ;;  %v2824_v52 = vld [vmem:[%s4132_s5 + $0x100] sm:$0xff] }
  0xae   : > { %v429_v16 = vsel %vm313_vm1, %v424_v13, %v426_v14  ;;  %v430_v17 = vsel %vm313_vm1, %v426_v14, %v428_v12 }
  0xaf   : > { %v433_v19 = vsel %vm413_vm6, %v429_v16, 0.0  ;;  %v434_v20 = vsel %vm414_vm7, %v430_v17, 0.0  ;;  %vm987_vm6 = vcmask 1039360   ;;  %vm972_vm7 = vcmp.eq.s32.totalorder %v970_v53, 1  ;;  %v2813_v53 = vld [vmem:[%s4132_s5 + $0xf8] sm:$0xff] }
  0xb0   : > { %2730 = vmatpush.msk.msrb.mxu0 %vm317_vm0, %v433_v19  ;;  %2735 = vmatpush.msk.msrb.mxu1 %vm317_vm0, %v434_v20 }
  0xb1   : > { %2722 = vmatmul.msk.f32.gmra.mxu2 %vm313_vm1, %v2717_v18  ;;  %2727 = vmatmul.msk.f32.gmra.mxu3 %vm313_vm1, %v2717_v18 }
  0xb2   : > { %2731 = vmatmul.msk.f32.vlgmr.msrb.gmra.mxu0 %vm313_vm1, %v435_v21  ;;  %2736 = vmatmul.msk.f32.vlgmr.msrb.gmra.mxu1 %vm313_vm1, %v435_v21 }
  0xb4   : > { %v1107_v35 = vpop.permute.xlu2 %1106 }
  0xb5   : > { %v771_v25 = vpop.permute.xlu1 %770  ;;  %v769_v26 = vpop.permute.xlu0 %768 }
  0xb6   : > { %v776_v28 = vsel %vm774_vm8, %v771_v25, %v773_v24  ;;  %v775_v29 = vsel %vm774_vm8, %v769_v26, %v771_v25  ;;  %vm971_vm8 = vcmp.eq.s32.totalorder %v969_v55, 1  ;;  %v2769_v25 = vld [vmem:[%s4132_s5 + $0x88] sm:$0xff]  ;;  %v2782_v26 = vld [vmem:[%s4132_s5 + $0xa0] sm:$0xff] }
  0xb7   : > { %v780_v31 = vsel %vm759_vm9, %v776_v28, 0.0  ;;  %v779_v32 = vsel %vm758_vm10, %v775_v29, 0.0  ;;  %vm1328_vm9 = vcmp.ge.s32.totalorder %v1327_v4, 0  ;;  %vm1329_vm10 = vcmp.lt.s32.totalorder %v1327_v4, 16  ;;  %v2783_v29 = vld [vmem:[%s4132_s5 + $0xa8] sm:$0xff] }
  0xb8   : > { %2763 = vmatpush.msk.msra.mxu1 %vm317_vm0, %v780_v31  ;;  %2758 = vmatpush.msk.msra.mxu0 %vm317_vm0, %v779_v32  ;;  %vm1330_vm12 = vmand %vm1328_vm9, %vm1329_vm10  ;;  %v2784_v31 = vld [vmem:[%s4132_s5 + $0xb0] sm:$0xff]  ;;  %v2796_v32 = vld [vmem:[%s4132_s5 + $0xc0] sm:$0xff]  ;;  %vm1631_vm10 = vcmask 523264  }
  0xb9   : > { %2723 = vmatmul.msk.f32.gmra.mxu2 %vm313_vm1, %v2718_v27  ;;  %2728 = vmatmul.msk.f32.gmra.mxu3 %vm313_vm1, %v2718_v27  ;;  %v1331_v9 = vsel %vm1330_vm12, 1, %v3234_v38  ;;  %vm2101_vm12 = vcmask 916480  }
  0xba   : > { %2732 = vmatmul.msk.f32.gmra.mxu0 %vm313_vm1, %v436_v30  ;;  %2737 = vmatmul.msk.f32.gmra.mxu1 %vm313_vm1, %v436_v30  ;;  %v1333_v11 = vperm.slane %v1331_v9, 1  ;;  %v1332_v13 = vperm.slane %v1331_v9, 0  ;;  %v2771_v30 = vld [vmem:[%s4132_s5 + $0x98] sm:$0xff] }
  0xbc   : > { %v986_v51 = vpop.permute.xlu2 %985  ;;  %vm1334_vm14 = vcmp.eq.s32.totalorder %v1332_v13, 1 }
  0xc1   : > { %2724 = vmatmul.msk.f32.gmra.mxu2 %vm313_vm1, %v2719_v33  ;;  %2729 = vmatmul.msk.f32.gmra.mxu3 %vm313_vm1, %v2719_v33  ;;  %v2785_v33 = vld [vmem:[%s4132_s5 + $0xb8] sm:$0xff] }
  0xc2   : > { %2733 = vmatmul.msk.f32.gmra.mxu0 %vm313_vm1, %v437_v34  ;;  %2738 = vmatmul.msk.f32.gmra.mxu1 %vm313_vm1, %v437_v34  ;;  %v2797_v34 = vld [vmem:[%s4132_s5 + $0xc8] sm:$0xff] }
  0xc4   : > { %v1349_v7 = vpop.permute.xlu2 %1348 }
  0xc5   : > { %v1105_v37 = vpop.permute.xlu1 %1104  ;;  %v1103_v39 = vpop.permute.xlu0 %1102 }
  0xc6   : > { %v1110_v45 = vsel %vm1108_vm13, %v1105_v37, %v1107_v35  ;;  %v1109_v47 = vsel %vm1108_vm13, %v1103_v39, %v1105_v37  ;;  %vm1335_vm13 = vcmp.eq.s32.totalorder %v1333_v11, 1  ;;  %v2810_v35 = vld [vmem:[%s4132_s5 + $0xe0] sm:$0xff]  ;;  %v2811_v37 = vld [vmem:[%s4132_s5 + $0xe8] sm:$0xff]  ;;  %v2799_v39 = vld [vmem:[%s4132_s5 + $0xd8] sm:$0xff] }
  0xc7   : > { %v1114_v49 = vsel %vm1093_vm15, %v1110_v45, 0.0  ;;  %v1113_v50 = vsel %vm1092_vm2, %v1109_v47, 0.0  ;;  %vm1207_vm15 = vcmp.ge.s32.totalorder %v1206_v15, 0  ;;  %vm1208_vm2 = vcmp.lt.s32.totalorder %v1206_v15, 16 }
  0xc8   : > { %vm1209_vm3 = vmand %vm1207_vm15, %vm1208_vm2 }
  0xc9   : > { %2745 = vmatmul.msk.f32.vlgmr.msrb.gmra.mxu2 %vm313_vm1, %v2740_v40  ;;  %2750 = vmatmul.msk.f32.vlgmr.msrb.gmra.mxu3 %vm313_vm1, %v2740_v40  ;;  %v1210_v20 = vsel %vm1209_vm3, 1, %v3234_v38  ;;  %v2770_v38 = vld [vmem:[%s4132_s5 + $0x90] sm:$0xff] }
  0xca   : > { %2734 = vmatmul.msk.f32.gmra.mxu0 %vm313_vm1, %v438_v43  ;;  %2739 = vmatmul.msk.f32.gmra.mxu1 %vm313_vm1, %v438_v43  ;;  %v1212_v21 = vperm.slane %v1210_v20, 1  ;;  %v1211_v23 = vperm.slane %v1210_v20, 0  ;;  %v2812_v40 = vld [vmem:[%s4132_s5 + $0xf0] sm:$0xff]  ;;  %v359_v43 = vpop.f32.mrf.mxu1 }
  0xcb   : > { %2800 = vmatpush.msk.msrb.mxu2 %vm317_vm0, %v1113_v50  ;;  %2805 = vmatpush.msk.msrb.mxu3 %vm317_vm0, %v1114_v49 }
  0xcc   : > { %v1228_v41 = vpop.permute.xlu2 %1227  ;;  %vm1214_vm5 = vcmp.eq.s32.totalorder %v1212_v21, 1 }
  0xcd   : > { %v984_v54 = vpop.permute.xlu1 %983  ;;  %v982_v56 = vpop.permute.xlu0 %981 }
  0xce   : > { %v989_v58 = vsel %vm987_vm6, %v984_v54, %v986_v51  ;;  %v988_v59 = vsel %vm987_vm6, %v982_v56, %v984_v54  ;;  %vm1213_vm6 = vcmp.eq.s32.totalorder %v1211_v23, 1  ;;  %v2825_v56 = vld [vmem:[%s4132_s5 + $0x108] sm:$0xff] }
  0xcf   : > { %v993_v61 = vsel %vm972_vm7, %v989_v58, 0.0  ;;  %v992_v62 = vsel %vm971_vm8, %v988_v59, 0.0  ;;  %vm374_vm7 = vcmask 1047556   ;;  %vm1536_vm8 = vcmask 261120  }
  0xd0   : > { %2786 = vmatpush.msk.msrb.mxu0 %vm317_vm0, %v992_v62  ;;  %2791 = vmatpush.msk.msrb.mxu1 %vm317_vm0, %v993_v61  ;;  %v375_v49 = vsel %vm374_vm7, %v339_v42, 0.0  ;;  %v376_v50 = vsel %vm374_vm7, %v359_v43, 0.0  ;;  %v2826_v61 = vld [vmem:[%s4132_s5 + $0x110] sm:$0xff] }
  0xd1   : > { %2746 = vmatmul.msk.f32.gmra.mxu2 %vm313_vm1, %v2741_v57  ;;  %2751 = vmatmul.msk.f32.gmra.mxu3 %vm313_vm1, %v2741_v57  ;;  %v377_v51 = vadd.f32 %v376_v50, %v375_v49 }
  0xd2   : > { %2759 = vmatmul.msk.f32.vlgmr.msra.gmra.mxu0 %vm313_vm1, %v2754_v60  ;;  %2764 = vmatmul.msk.f32.vlgmr.msra.gmra.mxu1 %vm313_vm1, %v2754_v60 }
  0xd3   : > { %378 = vadd.xlane.f32.xlu1 %v377_v51 }
  0xd5   : > { %v1347_v5 = vpop.permute.xlu1 %1346  ;;  %v1345_v6 = vpop.permute.xlu0 %1344 }
  0xd6   : > { %v1352_v12 = vsel %vm1350_vm11, %v1347_v5, %v1349_v7  ;;  %v1351_v14 = vsel %vm1350_vm11, %v1345_v6, %v1347_v5  ;;  %vm1870_vm11 = vcmask 130048  }
  0xd7   : > { %v1356_v16 = vsel %vm1335_vm13, %v1352_v12, 0.0  ;;  %v1355_v17 = vsel %vm1334_vm14, %v1351_v14, 0.0  ;;  %vm2225_vm13 = vcmask 785408   ;;  %vm2349_vm14 = vcmask 654336  }
  0xd9   : > { %2747 = vmatmul.msk.f32.gmra.mxu2 %vm313_vm1, %v2742_v63  ;;  %2752 = vmatmul.msk.f32.gmra.mxu3 %vm313_vm1, %v2742_v63 }
  0xda   : > { %2760 = vmatmul.msk.f32.gmra.mxu0 %vm313_vm1, %v2755_v1  ;;  %2765 = vmatmul.msk.f32.gmra.mxu1 %vm313_vm1, %v2755_v1 }
  0xdd   : > { %v1226_v18 = vpop.permute.xlu1 %1225  ;;  %v1224_v19 = vpop.permute.xlu0 %1223 }
  0xde   : > { %v1231_v22 = vsel %vm1229_vm4, %v1226_v18, %v1228_v41  ;;  %v1230_v24 = vsel %vm1229_vm4, %v1224_v19, %v1226_v18 }
  0xdf   : > { %v1235_v27 = vsel %vm1214_vm5, %v1231_v22, 0.0  ;;  %v1234_v28 = vsel %vm1213_vm6, %v1230_v24, 0.0 }
  0xe0   : > { %2814 = vmatpush.msk.msra.mxu0 %vm317_vm0, %v1234_v28  ;;  %2819 = vmatpush.msk.msra.mxu1 %vm317_vm0, %v1235_v27 }
  0xe1   : > { %2748 = vmatmul.msk.f32.gmra.mxu2 %vm313_vm1, %v2743_v2  ;;  %2753 = vmatmul.msk.f32.gmra.mxu3 %vm313_vm1, %v2743_v2 }
  0xe2   : > { %2761 = vmatmul.msk.f32.gmra.mxu0 %vm313_vm1, %v2756_v3  ;;  %2766 = vmatmul.msk.f32.gmra.mxu1 %vm313_vm1, %v2756_v3  ;;  %v2827_v3 = vld [vmem:[%s4132_s5 + $0x118] sm:$0xff] }
  0xe5   : > { %v366_v44 = vpop.permute.xlu0 %365 }
  0xe6   : > { %v368_v45 = vadd.f32 %v366_v44, %v339_v42  ;;  %v369_v46 = vadd.f32 %v366_v44, %v359_v43 }
  0xe8   : > { %v370_v47 = vmax.f32 %v368_v45, 0.0  ;;  %v371_v48 = vmax.f32 %v369_v46, 0.0 }
  0xe9   : > { %2773 = vmatmul.msk.f32.vlgmr.msra.gmra.mxu2 %vm313_vm1, %v2768_v8  ;;  %2778 = vmatmul.msk.f32.vlgmr.msra.gmra.mxu3 %vm313_vm1, %v2768_v8 }
  0xea   : > { %2762 = vmatmul.msk.f32.gmra.mxu0 %vm313_vm1, %v2757_v10  ;;  %2767 = vmatmul.msk.f32.gmra.mxu1 %vm313_vm1, %v2757_v10  ;;  %372 = vst [vmem:[%s3562_s10] sm:$0xf] %v370_v47 }
  0xeb   : > { %2828 = vmatpush.msk.msra.mxu2 %vm317_vm0, %v1355_v17  ;;  %2833 = vmatpush.msk.msra.mxu3 %vm317_vm0, %v1356_v16  ;;  %373 = vst [vmem:[%s3562_s10 + $0x8] sm:$0xf] %v371_v48 }
  0xf1   : > { %2774 = vmatmul.msk.f32.gmra.mxu2 %vm313_vm1, %v2769_v25  ;;  %2779 = vmatmul.msk.f32.gmra.mxu3 %vm313_vm1, %v2769_v25 }
  0xf2   : > { %2787 = vmatmul.msk.f32.vlgmr.msrb.gmra.mxu0 %vm313_vm1, %v2782_v26  ;;  %2792 = vmatmul.msk.f32.vlgmr.msrb.gmra.mxu1 %vm313_vm1, %v2782_v26 }
  0xf9   : > { %2775 = vmatmul.msk.f32.gmra.mxu2 %vm313_vm1, %v2770_v38  ;;  %2780 = vmatmul.msk.f32.gmra.mxu3 %vm313_vm1, %v2770_v38 }
  0xfa   : > { %2788 = vmatmul.msk.f32.gmra.mxu0 %vm313_vm1, %v2783_v29  ;;  %2793 = vmatmul.msk.f32.gmra.mxu1 %vm313_vm1, %v2783_v29 }
 0x101   : > { %2776 = vmatmul.msk.f32.gmra.mxu2 %vm313_vm1, %v2771_v30  ;;  %2781 = vmatmul.msk.f32.gmra.mxu3 %vm313_vm1, %v2771_v30 }
 0x102   : > { %2789 = vmatmul.msk.f32.gmra.mxu0 %vm313_vm1, %v2784_v31  ;;  %2794 = vmatmul.msk.f32.gmra.mxu1 %vm313_vm1, %v2784_v31 }
 0x109   : > { %2801 = vmatmul.msk.f32.vlgmr.msrb.gmra.mxu2 %vm313_vm1, %v2796_v32  ;;  %2806 = vmatmul.msk.f32.vlgmr.msrb.gmra.mxu3 %vm313_vm1, %v2796_v32 }
 0x10a   : > { %2790 = vmatmul.msk.f32.gmra.mxu0 %vm313_vm1, %v2785_v33  ;;  %2795 = vmatmul.msk.f32.gmra.mxu1 %vm313_vm1, %v2785_v33 }
 0x111   : > { %2802 = vmatmul.msk.f32.gmra.mxu2 %vm313_vm1, %v2797_v34  ;;  %2807 = vmatmul.msk.f32.gmra.mxu3 %vm313_vm1, %v2797_v34 }
 0x112   : > { %2815 = vmatmul.msk.f32.vlgmr.msra.gmra.mxu0 %vm313_vm1, %v2810_v35  ;;  %2820 = vmatmul.msk.f32.vlgmr.msra.gmra.mxu1 %vm313_vm1, %v2810_v35 }
 0x119   : > { %2803 = vmatmul.msk.f32.gmra.mxu2 %vm313_vm1, %v2798_v36  ;;  %2808 = vmatmul.msk.f32.gmra.mxu3 %vm313_vm1, %v2798_v36 }
 0x11a   : > { %2816 = vmatmul.msk.f32.gmra.mxu0 %vm313_vm1, %v2811_v37  ;;  %2821 = vmatmul.msk.f32.gmra.mxu1 %vm313_vm1, %v2811_v37 }
 0x121   : > { %2804 = vmatmul.msk.f32.gmra.mxu2 %vm313_vm1, %v2799_v39  ;;  %2809 = vmatmul.msk.f32.gmra.mxu3 %vm313_vm1, %v2799_v39 }
 0x122   : > { %2817 = vmatmul.msk.f32.gmra.mxu0 %vm313_vm1, %v2812_v40  ;;  %2822 = vmatmul.msk.f32.gmra.mxu1 %vm313_vm1, %v2812_v40 }
 0x129   : > { %2829 = vmatmul.msk.f32.vlgmr.msra.gmra.mxu2 %vm313_vm1, %v2824_v52  ;;  %2834 = vmatmul.msk.f32.vlgmr.msra.gmra.mxu3 %vm313_vm1, %v2824_v52 }
 0x12a   : > { %2818 = vmatmul.msk.f32.gmra.mxu0 %vm313_vm1, %v2813_v53  ;;  %2823 = vmatmul.msk.f32.gmra.mxu1 %vm313_vm1, %v2813_v53 }
 0x12c   : > { %v511_v54 = vpop.f32.mrf.mxu2  ;;  %v540_v55 = vpop.f32.mrf.mxu3 }
 0x12f   : > { %v587_v57 = vpop.f32.mrf.mxu0  ;;  %v616_v58 = vpop.f32.mrf.mxu1 }
 0x130   : > { %v588_v45 = vadd.f32 %v587_v57, %v511_v54  ;;  %v617_v46 = vadd.f32 %v616_v58, %v540_v55 }
 0x131   : > { %2830 = vmatmul.msk.f32.gmra.mxu2 %vm313_vm1, %v2825_v56  ;;  %2835 = vmatmul.msk.f32.gmra.mxu3 %vm313_vm1, %v2825_v56 }
 0x134   : > { %v514_v59 = vpop.f32.mrf.mxu2  ;;  %v543_v60 = vpop.f32.mrf.mxu3 }
 0x137   : > { %v590_v62 = vpop.f32.mrf.mxu0  ;;  %v619_v63 = vpop.f32.mrf.mxu1 }
 0x138   : > { %v591_v56 = vadd.f32 %v590_v62, %v514_v59 }
 0x139   : > { %2831 = vmatmul.msk.f32.gmra.mxu2 %vm313_vm1, %v2826_v61  ;;  %2836 = vmatmul.msk.f32.gmra.mxu3 %vm313_vm1, %v2826_v61  ;;  %v620_v61 = vadd.f32 %v619_v63, %v543_v60 }
 0x13c   : > { %v3586_v1 = vpop.f32.mrf.mxu2  ;;  %v3588_v2 = vpop.f32.mrf.mxu3 }
 0x13f   : > { %v3593_v4 = vpop.f32.mrf.mxu0  ;;  %v3595_v5 = vpop.f32.mrf.mxu1 }
 0x140   : > { %v594_v59 = vadd.f32 %v3593_v4, %v3586_v1  ;;  %v623_v60 = vadd.f32 %v3595_v5, %v3588_v2 }
 0x141   : > { %2832 = vmatmul.msk.f32.gmra.mxu2 %vm313_vm1, %v2827_v3  ;;  %2837 = vmatmul.msk.f32.gmra.mxu3 %vm313_vm1, %v2827_v3  ;;  %vm1519_vm1 = vcmask 392192  }
 0x144   : > { %v3599_v6 = vpop.f32.mrf.mxu2  ;;  %v3601_v7 = vpop.f32.mrf.mxu3 }
 0x147   : > { %v3603_v8 = vpop.f32.mrf.mxu0  ;;  %v3605_v9 = vpop.f32.mrf.mxu1 }
 0x14c   : > { %v700_v10 = vpop.f32.mrf.mxu2  ;;  %v729_v11 = vpop.f32.mrf.mxu3 }
 0x14d   : > { %v741_v48 = vadd.f32 %v700_v10, %v588_v45  ;;  %v742_v49 = vadd.f32 %v729_v11, %v617_v46  ;;  %v4152_v46 = vmov 0.0  }
 0x14f   : > { %v821_v12 = vpop.f32.mrf.mxu0  ;;  %v850_v13 = vpop.f32.mrf.mxu1 }
 0x150   : > { %v862_v52 = vadd.f32 %v821_v12, %v741_v48  ;;  %v863_v53 = vadd.f32 %v850_v13, %v742_v49 }
 0x154   : > { %v703_v14 = vpop.f32.mrf.mxu2  ;;  %v732_v15 = vpop.f32.mrf.mxu3 }
 0x157   : > { %v824_v16 = vpop.f32.mrf.mxu0  ;;  %v853_v19 = vpop.f32.mrf.mxu1 }
 0x15c   : > { %v706_v17 = vpop.f32.mrf.mxu2  ;;  %v735_v18 = vpop.f32.mrf.mxu3 }
 0x15d   : > { %v745_v12 = vadd.f32 %v706_v17, %v594_v59  ;;  %v746_v13 = vadd.f32 %v735_v18, %v623_v60  ;;  %v597_v18 = vadd.f32 %v3603_v8, %v3599_v6  ;;  %v626_v6 = vadd.f32 %v3605_v9, %v3601_v7 }
 0x15f   : > { %v3611_v21 = vpop.f32.mrf.mxu0  ;;  %v3613_v22 = vpop.f32.mrf.mxu1 }
 0x160   : > { %v866_v1 = vadd.f32 %v3611_v21, %v745_v12  ;;  %v867_v2 = vadd.f32 %v3613_v22, %v746_v13 }
 0x164   : > { %v3607_v41 = vpop.f32.mrf.mxu2  ;;  %v3609_v20 = vpop.f32.mrf.mxu3 }
 0x165   : > { %4146 = vst [vmem:[#allocation4_spill] sm:$0xff] %v3609_v20 }
 0x167   : > { %v3615_v25 = vpop.f32.mrf.mxu0  ;;  %v3617_v26 = vpop.f32.mrf.mxu1 }
 0x168   : > { %4147 = vst [vmem:[#allocation5_spill] sm:$0xff] %v3615_v25 }
 0x169   : > { %4148 = vst [vmem:[#allocation6_spill] sm:$0xff] %v3617_v26  ;;  %v743_v26 = vadd.f32 %v703_v14, %v591_v56 }
 0x16b   : > { %v864_v58 = vadd.f32 %v824_v16, %v743_v26 }
 0x16c   : > { %v913_v23 = vpop.f32.mrf.mxu2  ;;  %v942_v24 = vpop.f32.mrf.mxu3 }
 0x16d   : > { %v954_v3 = vadd.f32 %v913_v23, %v862_v52  ;;  %v955_v0 = vadd.f32 %v942_v24, %v863_v53 }
 0x16f   : > { %v1034_v38 = vpop.f32.mrf.mxu0  ;;  %v1063_v29 = vpop.f32.mrf.mxu1  ;;  %v4151_v8 = vld [vmem:[#allocation5_spill] sm:$0xff] }
 0x170   : > { %v1075_v55 = vadd.f32 %v1034_v38, %v954_v3  ;;  %v1076_v57 = vadd.f32 %v1063_v29, %v955_v0  ;;  %v747_v29 = vadd.f32 %v3607_v41, %v597_v18  ;;  %v4155_v56 = vld [vmem:[#allocation6_spill] sm:$0xff] }
 0x174   : > { %v916_v27 = vpop.f32.mrf.mxu2  ;;  %v945_v28 = vpop.f32.mrf.mxu3 }
 0x175   : > { %v956_v62 = vadd.f32 %v916_v27, %v864_v58 }
 0x177   : > { %v1037_v32 = vpop.f32.mrf.mxu0  ;;  %v1066_v35 = vpop.f32.mrf.mxu1 }
 0x178   : > { %v1077_v0 = vadd.f32 %v1037_v32, %v956_v62 }
 0x17c   : > { %v919_v30 = vpop.f32.mrf.mxu2  ;;  %v948_v31 = vpop.f32.mrf.mxu3 }
 0x17f   : > { %v1040_v39 = vpop.f32.mrf.mxu0  ;;  %v1069_v40 = vpop.f32.mrf.mxu1 }
 0x184   : > { %v3619_v33 = vpop.f32.mrf.mxu2  ;;  %v3621_v34 = vpop.f32.mrf.mxu3 }
 0x185   : > { %4149 = vst [vmem:[#allocation7_spill] sm:$0xff] %v3619_v33  ;;  %v744_v33 = vadd.f32 %v732_v15, %v620_v61 }
 0x186   : > { %4150 = vst [vmem:[#allocation8_spill] sm:$0xff] %v3621_v34 }
 0x187   : > { %v3623_v44 = vpop.f32.mrf.mxu0  ;;  %v3625_v47 = vpop.f32.mrf.mxu1  ;;  %v865_v10 = vadd.f32 %v853_v19, %v744_v33 }
 0x189   : > { %v957_v63 = vadd.f32 %v945_v28, %v865_v10  ;;  %v959_v28 = vadd.f32 %v948_v31, %v867_v2 }
 0x18b   : > { %v1078_v16 = vadd.f32 %v1066_v35, %v957_v63  ;;  %v1080_v35 = vadd.f32 %v1069_v40, %v959_v28  ;;  %v4153_v40 = vld [vmem:[#allocation4_spill] sm:$0xff] }
 0x18c   : > { %v1155_v36 = vpop.f32.mrf.mxu2  ;;  %v1184_v37 = vpop.f32.mrf.mxu3  ;;  %v748_v49 = vadd.f32 %v4153_v40, %v626_v6  ;;  %v4154_v52 = vld [vmem:[#allocation7_spill] sm:$0xff] }
 0x18d   : > { %v1196_v11 = vadd.f32 %v1155_v36, %v1075_v55  ;;  %v1197_v45 = vadd.f32 %v1184_v37, %v1076_v57  ;;  %v4156_v58 = vld [vmem:[#allocation8_spill] sm:$0xff] }
 0x18e   : > { %v869_v61 = vadd.f32 %v4155_v56, %v748_v49 }
 0x18f   : > { %v1276_v34 = vpop.f32.mrf.mxu0  ;;  %v1305_v20 = vpop.f32.mrf.mxu1 }
 0x190   : > { %v1317_v14 = vadd.f32 %v1276_v34, %v1196_v11  ;;  %v1318_v15 = vadd.f32 %v1305_v20, %v1197_v45  ;;  %v958_v20 = vadd.f32 %v919_v30, %v866_v1  ;;  %v868_v30 = vadd.f32 %v4151_v8, %v747_v29 }
 0x191   : > { %v961_v10 = vadd.f32 %v4156_v58, %v869_v61 }
 0x192   : > { %v1079_v33 = vadd.f32 %v1040_v39, %v958_v20  ;;  %v960_v53 = vadd.f32 %v4154_v52, %v868_v30 }
 0x193   : > { %v1082_v60 = vadd.f32 %v3625_v47, %v961_v10  ;;  %v2839_v10 = vld [vmem:[%s4133_s6 + $0x28] sm:$0xff] }
 0x194   : > { %v1158_v42 = vpop.f32.mrf.mxu2  ;;  %v1187_v43 = vpop.f32.mrf.mxu3  ;;  %v1081_v3 = vadd.f32 %v3623_v44, %v960_v53  ;;  %v2838_v53 = vld [vmem:[%s4133_s6 + $0x20] sm:$0xff] }
 0x195   : > { %v1198_v5 = vadd.f32 %v1158_v42, %v1077_v0  ;;  %v1199_v27 = vadd.f32 %v1187_v43, %v1078_v16 }
 0x197   : > { %v1279_v23 = vpop.f32.mrf.mxu0  ;;  %v1308_v4 = vpop.f32.mrf.mxu1 }
 0x198   : > { %v1319_v32 = vadd.f32 %v1279_v23, %v1198_v5  ;;  %v1320_v21 = vadd.f32 %v1308_v4, %v1199_v27 }
 0x19c   : > { %v1161_v50 = vpop.f32.mrf.mxu2  ;;  %v1190_v51 = vpop.f32.mrf.mxu3 }
 0x19d   : > { %v1200_v31 = vadd.f32 %v1161_v50, %v1079_v33  ;;  %v1201_v43 = vadd.f32 %v1190_v51, %v1080_v35 }
 0x19f   : > { %v1282_v42 = vpop.f32.mrf.mxu0  ;;  %v1311_v48 = vpop.f32.mrf.mxu1 }
 0x1a0   : > { %v1321_v7 = vadd.f32 %v1282_v42, %v1200_v31  ;;  %v1322_v9 = vadd.f32 %v1311_v48, %v1201_v43 }
 0x1a4   : > { %v3627_v25 = vpop.f32.mrf.mxu2  ;;  %v3629_v54 = vpop.f32.mrf.mxu3 }
 0x1a5   : > { %v1202_v11 = vadd.f32 %v3627_v25, %v1081_v3  ;;  %v1203_v63 = vadd.f32 %v3629_v54, %v1082_v60  ;;  %v2567_v3 = vld [vmem:[%s4134_s7] sm:$0xff] }
 0x1a7   : > { %v1285_v59 = vpop.f32.mrf.mxu0  ;;  %v1314_v13 = vpop.f32.mrf.mxu1 }
 0x1a8   : > { %v1323_v44 = vadd.f32 %v1285_v59, %v1202_v11 }
 0x1ac   : > { %v1397_v24 = vpop.f32.mrf.mxu2  ;;  %v1426_v38 = vpop.f32.mrf.mxu3 }
 0x1ad   : > { %v3635_v19 = vadd.f32 %v1397_v24, %v1317_v14  ;;  %v3637_v26 = vadd.f32 %v1426_v38, %v1318_v15  ;;  %v1324_v15 = vadd.f32 %v1314_v13, %v1203_v63  ;;  %v2840_v63 = vld [vmem:[%s4133_s6 + $0x30] sm:$0xff] }
 0x1af   : > { %v2973_v17 = vpack.i.bf16 %v3637_v26, %v3635_v19  ;;  %v3113_v24 = vpack.i.bf16 0.0, %v3637_v26  ;;  %v3732_v4 = vpack.i.bf16 %v3635_v19, %v4152_v46 }
 0x1b1   : > { %2974 = vrot.lane.b32.xlu2 %v2973_v17, %s3235_s20 }
 0x1b4   : > { %v1400_v34 = vpop.f32.mrf.mxu2  ;;  %v1429_v22 = vpop.f32.mrf.mxu3 }
 0x1b5   : > { %v3647_v36 = vadd.f32 %v1400_v34, %v1319_v32  ;;  %v3649_v37 = vadd.f32 %v1429_v22, %v1320_v21  ;;  %v3242_v21 = vmov 256.0   ;;  %v3750_v22 = vpop.xlane.xlu1 %378 }
 0x1b6   : > { %3215 = vrcp.f32 %v3242_v21 }
 0x1b7   : > { %v3655_v41 = vpack.i.bf16 0.0, %v3649_v37  ;;  %v2978_v39 = vpack.i.bf16 %v3647_v36, %v4152_v46  ;;  %v3103_v38 = vpack.i.bf16 %v3649_v37, %v3647_v36 }
 0x1b9   : > { %2984 = vrot.lane.b32.xlu0 %v3655_v41, %s3235_s20  ;;  %2979 = vrot.lane.b32.xlu2 %v2978_v39, %s3235_s20 }
 0x1ba   : > { %3014 = vrot.lane.b32.xlu1 %v3655_v41, %s3236_s21 }
 0x1bc   : > { %v1403_v50 = vpop.f32.mrf.mxu2  ;;  %v1432_v51 = vpop.f32.mrf.mxu3 }
 0x1bd   : > { %v3668_v55 = vadd.f32 %v1403_v50, %v1321_v7  ;;  %v3670_v57 = vadd.f32 %v1432_v51, %v1322_v9  ;;  %v3216_v40 = vpop.eup %3215 }
 0x1be   : > { %v381_v7 = vmul.f32 256.0, %v3216_v40  ;;  %vm385_vm9 = vweird.f32 %v3216_v40 }
 0x1bf   : > { %v2988_v45 = vpack.i.bf16 %v3670_v57, %v3668_v55  ;;  %v3098_v54 = vpack.i.bf16 0.0, %v3670_v57  ;;  %v3724_v16 = vpack.i.bf16 %v3668_v55, %v4152_v46 }
 0x1c0   : > { %v382_v58 = vsub.f32 1.0, %v381_v7 }
 0x1c1   : > { %2989 = vrot.lane.b32.xlu0 %v2988_v45, %s3235_s20 }
 0x1c2   : > { %3059 = vrot.lane.b32.xlu1 %v2973_v17, %s3237_s22  ;;  %v383_v11 = vmul.f32 %v3216_v40, %v382_v58  ;;  %v1475_v58 = vld [vmem:[%s4133_s6 + $0x8] sm:$0xff] }
 0x1c4   : > { %v1406_v62 = vpop.f32.mrf.mxu2  ;;  %v1435_v14 = vpop.f32.mrf.mxu3 }
 0x1c5   : > { %v3680_v12 = vadd.f32 %v1406_v62, %v1323_v44  ;;  %v3687_v47 = vadd.f32 %v1435_v14, %v1324_v15  ;;  %v2570_v44 = vld [vmem:[%s4134_s7 + $0x18] sm:$0xff]  ;;  %v384_v62 = vadd.f32 %v3216_v40, %v383_v11 }
 0x1c7   : > { %v2998_v25 = vpack.i.bf16 %v3680_v12, %v4152_v46  ;;  %v3003_v23 = vpack.i.bf16 0.0, %v3687_v47  ;;  %v3128_v0 = vpack.i.bf16 %v3687_v47, %v3680_v12  ;;  %v386_v13 = vsel %vm385_vm9, %v3216_v40, %v384_v62 }
 0x1c9   : > { %2994 = vrot.lane.b32.xlu0 %v2988_v45, %s3236_s21  ;;  %2999 = vrot.lane.b32.xlu2 %v2998_v25, %s3235_s20 }
 0x1ca   : > { %3064 = vrot.lane.b32.xlu1 %v2988_v45, %s3238_s23 }
 0x1d1   : > { %3019 = vrot.lane.b32.xlu0 %v2973_v17, %s3236_s21  ;;  %3004 = vrot.lane.b32.xlu2 %v3003_v23, %s3235_s20 }
 0x1d2   : > { %3089 = vrot.lane.b32.xlu1 %v2973_v17, %s3238_s23 }
 0x1d9   : > { %3029 = vrot.lane.b32.xlu0 %v2998_v25, %s3236_s21  ;;  %3009 = vrot.lane.b32.xlu2 %v2978_v39, %s3236_s21 }
 0x1da   : > { %3099 = vrot.lane.b32.xlu1 %v3098_v54, %s3239_s24 }
 0x1e1   : > { %3044 = vrot.lane.b32.xlu0 %v3003_v23, %s3237_s22  ;;  %3024 = vrot.lane.b32.xlu2 %v2988_v45, %s3237_s22 }
 0x1e2   : > { %3114 = vrot.lane.b32.xlu1 %v3113_v24, %s3239_s24 }
 0x1e9   : > { %3049 = vrot.lane.b32.xlu0 %v2978_v39, %s3237_s22  ;;  %3034 = vrot.lane.b32.xlu2 %v3003_v23, %s3236_s21 }
 0x1ea   : > { %3124 = vrot.lane.b32.xlu1 %v3098_v54, %s3240_s25 }
 0x1f1   : > { %3069 = vrot.lane.b32.xlu0 %v2998_v25, %s3238_s23  ;;  %3039 = vrot.lane.b32.xlu2 %v2998_v25, %s3237_s22 }
 0x1f2   : > { %3149 = vrot.lane.b32.xlu1 %v3113_v24, %s3240_s25 }
 0x1f9   : > { %3074 = vrot.lane.b32.xlu0 %v2978_v39, %s3238_s23  ;;  %3054 = vrot.lane.b32.xlu2 %v3655_v41, %s3237_s22 }
 0x1fa   : > { %3159 = vrot.lane.b32.xlu1 %v3098_v54, %s3241_s26 }
 0x201   : > { %3104 = vrot.lane.b32.xlu0 %v3103_v38, %s3239_s24  ;;  %3079 = vrot.lane.b32.xlu2 %v3003_v23, %s3238_s23 }
 0x202   : > { %3174 = vrot.lane.b32.xlu1 %v3113_v24, %s3241_s26 }
 0x209   : > { %3129 = vrot.lane.b32.xlu0 %v3128_v0, %s3239_s24  ;;  %3084 = vrot.lane.b32.xlu2 %v3655_v41, %s3238_s23 }
 0x20a   : > { %3184 = vrot.lane.b32.xlu1 %v3098_v54, %s3236_s21  ;;  %v388_v54 = vld [vmem:[%s4131_s4] sm:$0xf] }
 0x20b   : > { %v2975_v1 = vpop.permute.xlu2 %2974 }
 0x20c   : > { %v2977_v46 = vunpack.i.h.bf16 %v2975_v1  ;;  %v2976_v39 = vunpack.i.l.bf16 %v2975_v1 }
 0x20e   : > { %v1521_v56 = vsel %vm1519_vm1, %v2976_v39, %v2977_v46  ;;  %v1474_v46 = vld [vmem:[%s4133_s6] sm:$0xff] }
 0x211   : > { %3134 = vrot.lane.b32.xlu0 %v3128_v0, %s3240_s25  ;;  %3094 = vrot.lane.b32.xlu2 %v3724_v16, %s3239_s24 }
 0x212   : > { %3209 = vrot.lane.b32.xlu1 %v3113_v24, %s3236_s21 }
 0x213   : > { %v2980_v2 = vpop.permute.xlu2 %2979 }
 0x214   : > { %v2982_v30 = vunpack.i.h.bf16 %v2980_v2  ;;  %v2981_v31 = vunpack.i.l.bf16 %v2980_v2 }
 0x216   : > { %v1522_v49 = vsel %vm1519_vm1, %v2981_v31, %v2982_v30 }
 0x219   : > { %3139 = vrot.lane.b32.xlu0 %v3103_v38, %s3240_s25  ;;  %3109 = vrot.lane.b32.xlu2 %v3732_v4, %s3239_s24 }
 0x221   : > { %3164 = vrot.lane.b32.xlu0 %v3103_v38, %s3241_s26  ;;  %3119 = vrot.lane.b32.xlu2 %v3724_v16, %s3240_s25 }
 0x223   : > { %v3000_v5 = vpop.permute.xlu2 %2999 }
 0x224   : > { %v3002_v27 = vunpack.i.h.bf16 %v3000_v5  ;;  %v3001_v17 = vunpack.i.l.bf16 %v3000_v5 }
 0x226   : > { %v1526_v18 = vsel %vm1519_vm1, %v3001_v17, %v3002_v27 }
 0x227   : > { %1561 = vmatpush.msrb.mxu0 %v1526_v18 }
 0x229   : > { %3189 = vrot.lane.b32.xlu0 %v3128_v0, %s3241_s26  ;;  %3144 = vrot.lane.b32.xlu2 %v3732_v4, %s3240_s25 }
 0x22b   : > { %v2985_v20 = vpop.permute.xlu0 %2984  ;;  %v3005_v28 = vpop.permute.xlu2 %3004 }
 0x22c   : > { %v3006_v29 = vunpack.i.l.bf16 %v3005_v28  ;;  %v3007_v35 = vunpack.i.h.bf16 %v3005_v28  ;;  %v2986_v42 = vunpack.i.l.bf16 %v2985_v20  ;;  %v2987_v48 = vunpack.i.h.bf16 %v2985_v20  ;;  %v3766_v61 = vpop.permute.xlu1 %3014  ;;  %v2568_v20 = vld [vmem:[%s4134_s7 + $0x8] sm:$0xff] }
 0x22d   : > { %v390_v28 = vrot.slane %v388_v54, 4  ;;  %v1476_v54 = vld [vmem:[%s4133_s6 + $0x10] sm:$0xff] }
 0x22e   : > { %v1527_v32 = vsel %vm1519_vm1, %v3002_v27, %v3006_v29  ;;  %v1523_v52 = vsel %vm1519_vm1, %v2982_v30, %v2986_v42  ;;  %v1520_v51 = vsel %vm1519_vm1, %v2987_v48, %v2976_v39  ;;  %v387_v29 = vmul.f32 %v386_v13, %v3750_v22  ;;  %v2841_v30 = vld [vmem:[%s4133_s6 + $0x38] sm:$0xff] }
 0x22f   : > { %1590 = vmatpush.msrb.mxu1 %v1527_v32 }
 0x230   : > { %v392_v31 = vadd.f32 %v390_v28, %v387_v29 }
 0x231   : > { %3194 = vrot.lane.b32.xlu0 %v3128_v0, %s3236_s21  ;;  %3154 = vrot.lane.b32.xlu2 %v3724_v16, %s3241_s26 }
 0x233   : > { %v2990_v33 = vpop.permute.xlu0 %2989  ;;  %v3748_v34 = vpop.permute.xlu2 %3009 }
 0x234   : > { %v2992_v6 = vunpack.i.h.bf16 %v2990_v33  ;;  %v2991_v8 = vunpack.i.l.bf16 %v2990_v33  ;;  %v3782_v60 = vpop.permute.xlu1 %3059  ;;  %v3012_v1 = vunpack.i.h.bf16 %v3748_v34  ;;  %v3011_v5 = vunpack.i.l.bf16 %v3748_v34 }
 0x235   : > { %v3016_v34 = vunpack.i.l.bf16 %v3766_v61  ;;  %v3061_v62 = vunpack.i.l.bf16 %v3782_v60 }
 0x236   : > { %v1524_v43 = vsel %vm1519_vm1, %v3007_v35, %v2991_v8  ;;  %v1525_v41 = vsel %vm1519_vm1, %v2991_v8, %v2992_v6  ;;  %v3017_v8 = vunpack.i.h.bf16 %v3766_v61  ;;  %v1634_v22 = vsel %vm1631_vm10, %v3011_v5, %v3012_v1 }
 0x237   : > { %1562 = vmatpush.msrb.mxu0 %v1524_v43  ;;  %1591 = vmatpush.msrb.mxu1 %v1525_v41  ;;  %v1635_v41 = vsel %vm1631_vm10, %v3012_v1, %v3016_v34  ;;  %v2860_v34 = vld [vmem:[%s4133_s6 + $0x50] sm:$0xff] }
 0x239   : > { %3199 = vrot.lane.b32.xlu0 %v3103_v38, %s3236_s21  ;;  %3169 = vrot.lane.b32.xlu2 %v3732_v4, %s3241_s26 }
 0x23a   : > { %1563 = vmatpush.msrb.mxu0 %v1522_v49  ;;  %1592 = vmatpush.msrb.mxu1 %v1523_v52 }
 0x23b   : > { %v2995_v9 = vpop.permute.xlu0 %2994  ;;  %v3762_v50 = vpop.permute.xlu2 %3024 }
 0x23c   : > { %1564 = vmatpush.msrb.mxu0 %v1520_v51  ;;  %1593 = vmatpush.msrb.mxu1 %v1521_v56  ;;  %v2996_v2 = vunpack.i.l.bf16 %v2995_v9  ;;  %v3806_v32 = vpop.permute.xlu1 %3064  ;;  %v3026_v39 = vunpack.i.l.bf16 %v3762_v50  ;;  %v3027_v52 = vunpack.i.h.bf16 %v3762_v50  ;;  %v393_v51 = vmax.f32 %v392_v31, 0.0  ;;  %v2861_v31 = vld [vmem:[%s4133_s6 + $0x58] sm:$0xff] }
 0x23d   : > { %2842 = vmatmul.msk.f32.vlgmr.msrb.gmra.mxu0 %vm1536_vm8, %v2838_v53  ;;  %2846 = vmatmul.msk.f32.vlgmr.msrb.gmra.mxu1 %vm1536_vm8, %v2838_v53 }
 0x23e   : > { %v1752_v56 = vsel %vm1536_vm8, %v3026_v39, %v3027_v52 }
 0x241   : > { %2573 = vperm.xlu0 %2972, %v2567_v3   ;;  %3179 = vrot.lane.b32.xlu2 %v3724_v16, %s3236_s21 }
 0x243   : > { %v3778_v45 = vpop.permute.xlu0 %3019  ;;  %v3035_v59 = vpop.permute.xlu2 %3034 }
 0x244   : > { %v3037_v25 = vunpack.i.h.bf16 %v3035_v59  ;;  %v3036_v14 = vunpack.i.l.bf16 %v3035_v59  ;;  %v3021_v21 = vunpack.i.l.bf16 %v3778_v45  ;;  %v3022_v35 = vunpack.i.h.bf16 %v3778_v45  ;;  %v3833_v50 = vpop.permute.xlu1 %3089 }
 0x245   : > { %2843 = vmatmul.msk.f32.gmra.mxu0 %vm1536_vm8, %v2839_v10  ;;  %2847 = vmatmul.msk.f32.gmra.mxu1 %vm1536_vm8, %v2839_v10  ;;  %v3091_v28 = vunpack.i.l.bf16 %v3833_v50 }
 0x246   : > { %v1636_v33 = vsel %vm1631_vm10, %v3037_v25, %v2996_v2  ;;  %v1632_v49 = vsel %vm1631_vm10, %v3017_v8, %v3021_v21  ;;  %v1633_v53 = vsel %vm1631_vm10, %v3021_v21, %v3022_v35  ;;  %v2858_v25 = vld [vmem:[%s4133_s6 + $0x40] sm:$0xff] }
 0x249   : > { %2588 = vperm.xlu0 %2972, %v2570_v44   ;;  %3204 = vrot.lane.b32.xlu2 %v3732_v4, %s3236_s21  ;;  %v2997_v4 = vunpack.i.h.bf16 %v2995_v9  ;;  %v3062_v44 = vunpack.i.h.bf16 %v3782_v60 }
 0x24b   : > { %v3030_v15 = vpop.permute.xlu0 %3029  ;;  %v3040_v23 = vpop.permute.xlu2 %3039  ;;  %v1637_v6 = vsel %vm1631_vm10, %v2996_v2, %v2997_v4  ;;  %v3067_v4 = vunpack.i.h.bf16 %v3806_v32 }
 0x24c   : > { %v3032_v24 = vunpack.i.h.bf16 %v3030_v15  ;;  %v3031_v38 = vunpack.i.l.bf16 %v3030_v15  ;;  %v3042_v0 = vunpack.i.h.bf16 %v3040_v23  ;;  %v3041_v16 = vunpack.i.l.bf16 %v3040_v23 }
 0x24d   : > { %2844 = vmatmul.msk.f32.gmra.mxu0 %vm1536_vm8, %v2840_v63  ;;  %2848 = vmatmul.msk.f32.gmra.mxu1 %vm1536_vm8, %v2840_v63  ;;  %v1748_v15 = vsel %vm1536_vm8, %v3061_v62, %v3062_v44 }
 0x24e   : > { %v1638_v27 = vsel %vm1631_vm10, %v3031_v38, %v3032_v24  ;;  %v1639_v17 = vsel %vm1631_vm10, %v3032_v24, %v3036_v14  ;;  %v1753_v18 = vsel %vm1536_vm8, %v3041_v16, %v3042_v0  ;;  %v3855_v24 = vpop.permute.xlu1 %3099 }
 0x24f   : > { %1672 = vmatpush.msrb.mxu2 %v1638_v27  ;;  %1701 = vmatpush.msrb.mxu3 %v1639_v17  ;;  %v1477_v27 = vld [vmem:[%s4133_s6 + $0x18] sm:$0xff]  ;;  %v3101_v52 = vunpack.i.l.bf16 %v3855_v24 }
 0x250   : > { %1787 = vmatpush.msra.mxu0 %v1753_v18 }
 0x251   : > { %2578 = vperm.xlu2 %3213, %v2568_v20   ;;  %1673 = vmatpush.msrb.mxu2 %v1636_v33 }
 0x252   : > { %1702 = vmatpush.msrb.mxu3 %v1637_v6 }
 0x253   : > { %v3045_v42 = vpop.permute.xlu0 %3044  ;;  %v3055_v43 = vpop.permute.xlu2 %3054  ;;  %1674 = vmatpush.msrb.mxu2 %v1634_v22  ;;  %v2870_v22 = vld [vmem:[%s4133_s6 + $0x60] sm:$0xff] }
 0x254   : > { %v3047_v48 = vunpack.i.h.bf16 %v3045_v42  ;;  %v3046_v40 = vunpack.i.l.bf16 %v3045_v42  ;;  %1703 = vmatpush.msrb.mxu3 %v1635_v41  ;;  %v3057_v10 = vunpack.i.h.bf16 %v3055_v43  ;;  %v3056_v11 = vunpack.i.l.bf16 %v3055_v43  ;;  %v2871_v41 = vld [vmem:[%s4133_s6 + $0x68] sm:$0xff] }
 0x255   : > { %1675 = vmatpush.msrb.mxu2 %v1632_v49  ;;  %2845 = vmatmul.msk.f32.gmra.mxu0 %vm1536_vm8, %v2841_v30  ;;  %v3102_v49 = vunpack.i.h.bf16 %v3855_v24 }
 0x256   : > { %1704 = vmatpush.msrb.mxu3 %v1633_v53  ;;  %2850 = vmatmul.msk.f32.vlgmr.msrb.gmra.mxu2 %vm1536_vm8, %v1474_v46  ;;  %v1751_v7 = vsel %vm1536_vm8, %v3047_v48, %v3026_v39  ;;  %v1754_v9 = vsel %vm1536_vm8, %v3042_v0, %v3046_v40  ;;  %v1747_v14 = vsel %vm1536_vm8, %v3057_v10, %v3061_v62  ;;  %v3882_v29 = vpop.permute.xlu1 %3114 }
 0x257   : > { %2854 = vmatmul.msk.f32.vlgmr.msrb.gmra.mxu3 %vm1536_vm8, %v1474_v46  ;;  %1788 = vmatpush.msra.mxu0 %v1751_v7  ;;  %v3116_v10 = vunpack.i.l.bf16 %v3882_v29 }
 0x258   : > { %1816 = vmatpush.msra.mxu1 %v1754_v9 }
 0x259   : > { %396 = vperm.xlu2 %3213, %v393_v51   ;;  %2849 = vmatmul.msk.f32.gmra.mxu1 %vm1536_vm8, %v2841_v30 }
 0x25a   : > { %1817 = vmatpush.msra.mxu1 %v1752_v56 }
 0x25b   : > { %v3050_v61 = vpop.permute.xlu0 %3049  ;;  %v3080_v3 = vpop.permute.xlu2 %3079 }
 0x25c   : > { %v3052_v45 = vunpack.i.h.bf16 %v3050_v61  ;;  %v3051_v59 = vunpack.i.l.bf16 %v3050_v61  ;;  %v3081_v38 = vunpack.i.l.bf16 %v3080_v3  ;;  %v3082_v1 = vunpack.i.h.bf16 %v3080_v3  ;;  %v2882_v3 = vld [vmem:[%s4133_s6 + $0x80] sm:$0xff] }
 0x25e   : > { %2851 = vmatmul.msk.f32.gmra.mxu2 %vm1536_vm8, %v1475_v58  ;;  %v1749_v63 = vsel %vm1536_vm8, %v3051_v59, %v3052_v45  ;;  %v1750_v13 = vsel %vm1536_vm8, %v3052_v45, %v3056_v11  ;;  %v3900_v30 = vpop.permute.xlu1 %3124  ;;  %v2107_v11 = vsel %vm2101_vm12, %v3101_v52, %v3102_v49 }
 0x25f   : > { %2855 = vmatmul.msk.f32.gmra.mxu3 %vm1536_vm8, %v1475_v58  ;;  %1789 = vmatpush.msra.mxu0 %v1749_v63  ;;  %v3117_v58 = vunpack.i.h.bf16 %v3882_v29  ;;  %v3126_v24 = vunpack.i.l.bf16 %v3900_v30 }
 0x260   : > { %1818 = vmatpush.msra.mxu1 %v1750_v13 }
 0x261   : > { %1790 = vmatpush.msra.mxu0 %v1747_v14 }
 0x262   : > { %1819 = vmatpush.msra.mxu1 %v1748_v15  ;;  %2862 = vmatmul.msk.f32.vlgmr.msra.gmra.mxu0 %vm1536_vm8, %v2858_v25 }
 0x263   : > { %2866 = vmatmul.msk.f32.vlgmr.msra.gmra.mxu1 %vm1536_vm8, %v2858_v25  ;;  %1994 = vmatpush.msrb.mxu0 %v3680_v12  ;;  %v3070_v60 = vpop.permute.xlu0 %3069  ;;  %v3085_v23 = vpop.permute.xlu2 %3084  ;;  %v3066_v12 = vunpack.i.l.bf16 %v3806_v32  ;;  %v2872_v25 = vld [vmem:[%s4133_s6 + $0x70] sm:$0xff] }
 0x264   : > { %2023 = vmatpush.msrb.mxu1 %v3687_v47  ;;  %v3072_v0 = vunpack.i.h.bf16 %v3070_v60  ;;  %v3071_v16 = vunpack.i.l.bf16 %v3070_v60  ;;  %v3087_v17 = vunpack.i.h.bf16 %v3085_v23  ;;  %v3086_v18 = vunpack.i.l.bf16 %v3085_v23 }
 0x265   : > { %1995 = vmatpush.msrb.mxu0 %v3668_v55  ;;  %v2859_v55 = vld [vmem:[%s4133_s6 + $0x48] sm:$0xff]  ;;  %v1876_v47 = vsel %vm1870_vm11, %v3066_v12, %v3067_v4 }
 0x266   : > { %2024 = vmatpush.msrb.mxu1 %v3670_v57  ;;  %2852 = vmatmul.msk.f32.gmra.mxu2 %vm1536_vm8, %v1476_v54  ;;  %v1877_v2 = vsel %vm1870_vm11, %v3071_v16, %v3072_v0  ;;  %v1878_v5 = vsel %vm1870_vm11, %v3072_v0, %v3081_v38  ;;  %v1875_v57 = vsel %vm1870_vm11, %v3082_v1, %v3066_v12  ;;  %v3150_v45 = vpop.permute.xlu1 %3149  ;;  %v2883_v4 = vld [vmem:[%s4133_s6 + $0x88] sm:$0xff] }
 0x267   : > { %2856 = vmatmul.msk.f32.gmra.mxu3 %vm1536_vm8, %v1476_v54  ;;  %1996 = vmatpush.msrb.mxu0 %v3647_v36  ;;  %v1871_v33 = vsel %vm1870_vm11, %v3087_v17, %v3091_v28  ;;  %v3127_v54 = vunpack.i.h.bf16 %v3900_v30  ;;  %v2103_v38 = vsel %vm2101_vm12, %v3116_v10, %v3117_v58  ;;  %v3152_v17 = vunpack.i.h.bf16 %v3150_v45 }
 0x268   : > { %2025 = vmatpush.msrb.mxu1 %v3649_v37  ;;  %1911 = vmatpush.msra.mxu2 %v1877_v2 }
 0x269   : > { %1940 = vmatpush.msra.mxu3 %v1878_v5  ;;  %1997 = vmatpush.msrb.mxu0 %v3635_v19  ;;  %v2231_v12 = vsel %vm2225_vm13, %v3126_v24, %v3127_v54 }
 0x26a   : > { %2026 = vmatpush.msrb.mxu1 %v3637_v26  ;;  %1912 = vmatpush.msra.mxu2 %v1875_v57  ;;  %v3092_v26 = vunpack.i.h.bf16 %v3833_v50 }
 0x26b   : > { %1941 = vmatpush.msra.mxu3 %v1876_v47  ;;  %2863 = vmatmul.msk.f32.gmra.mxu0 %vm1536_vm8, %v2859_v55  ;;  %v3075_v36 = vpop.permute.xlu0 %3074  ;;  %v3095_v37 = vpop.permute.xlu2 %3094 }
 0x26c   : > { %2867 = vmatmul.msk.f32.gmra.mxu1 %vm1536_vm8, %v2859_v55  ;;  %v3077_v19 = vunpack.i.h.bf16 %v3075_v36  ;;  %v3076_v20 = vunpack.i.l.bf16 %v3075_v36  ;;  %v1872_v35 = vsel %vm1870_vm11, %v3091_v28, %v3092_v26  ;;  %v3097_v46 = vunpack.i.h.bf16 %v3095_v37  ;;  %v2873_v55 = vld [vmem:[%s4133_s6 + $0x78] sm:$0xff]  ;;  %v2884_v28 = vld [vmem:[%s4133_s6 + $0x90] sm:$0xff] }
 0x26d   : > { %v3096_v39 = vunpack.i.l.bf16 %v3095_v37 }
 0x26e   : > { %2853 = vmatmul.msk.f32.gmra.mxu2 %vm1536_vm8, %v1477_v27  ;;  %v1873_v32 = vsel %vm1870_vm11, %v3076_v20, %v3077_v19  ;;  %v1874_v21 = vsel %vm1870_vm11, %v3077_v19, %v3086_v18  ;;  %v2106_v61 = vsel %vm2101_vm12, %v3097_v46, %v3101_v52  ;;  %v3160_v57 = vpop.permute.xlu1 %3159  ;;  %v3151_v18 = vunpack.i.l.bf16 %v3150_v45 }
 0x26f   : > { %2857 = vmatmul.msk.f32.gmra.mxu3 %vm1536_vm8, %v1477_v27  ;;  %1913 = vmatpush.msra.mxu2 %v1873_v32  ;;  %v3161_v46 = vunpack.i.l.bf16 %v3160_v57 }
 0x270   : > { %1942 = vmatpush.msra.mxu3 %v1874_v21  ;;  %v2227_v29 = vsel %vm2225_vm13, %v3151_v18, %v3152_v17  ;;  %v2908_v17 = vld [vmem:[%s4133_s6 + $0xd0] sm:$0xff] }
 0x271   : > { %1914 = vmatpush.msra.mxu2 %v1871_v33  ;;  %v2894_v33 = vld [vmem:[%s4133_s6 + $0xa0] sm:$0xff] }
 0x272   : > { %1943 = vmatpush.msra.mxu3 %v1872_v35  ;;  %v2885_v35 = vld [vmem:[%s4133_s6 + $0x98] sm:$0xff] }
 0x273   : > { %2864 = vmatmul.msk.f32.gmra.mxu0 %vm1536_vm8, %v2860_v34  ;;  %v3105_v6 = vpop.permute.xlu0 %3104  ;;  %v3110_v8 = vpop.permute.xlu2 %3109 }
 0x274   : > { %2868 = vmatmul.msk.f32.gmra.mxu1 %vm1536_vm8, %v2860_v34  ;;  %v3107_v53 = vunpack.i.h.bf16 %v3105_v6  ;;  %v3106_v7 = vunpack.i.l.bf16 %v3105_v6  ;;  %v3112_v56 = vunpack.i.h.bf16 %v3110_v8  ;;  %v3111_v50 = vunpack.i.l.bf16 %v3110_v8 }
 0x276   : > { %2874 = vmatmul.msk.f32.vlgmr.msra.gmra.mxu2 %vm1536_vm8, %v2870_v22  ;;  %v2104_v59 = vsel %vm2101_vm12, %v3106_v7, %v3107_v53  ;;  %v2105_v63 = vsel %vm2101_vm12, %v3107_v53, %v3111_v50  ;;  %v2102_v13 = vsel %vm2101_vm12, %v3112_v56, %v3116_v10  ;;  %v3175_v34 = vpop.permute.xlu1 %3174 }
 0x277   : > { %2878 = vmatmul.msk.f32.vlgmr.msra.gmra.mxu3 %vm1536_vm8, %v2870_v22  ;;  %v2895_v22 = vld [vmem:[%s4133_s6 + $0xa8] sm:$0xff]  ;;  %v3177_v56 = vunpack.i.h.bf16 %v3175_v34  ;;  %v3176_v50 = vunpack.i.l.bf16 %v3175_v34 }
 0x27b   : > { %2865 = vmatmul.msk.f32.gmra.mxu0 %vm1536_vm8, %v2861_v31  ;;  %v3130_v42 = vpop.permute.xlu0 %3129  ;;  %v3120_v43 = vpop.permute.xlu2 %3119 }
 0x27c   : > { %2869 = vmatmul.msk.f32.gmra.mxu1 %vm1536_vm8, %v2861_v31  ;;  %v3132_v48 = vunpack.i.h.bf16 %v3130_v42  ;;  %v3131_v40 = vunpack.i.l.bf16 %v3130_v42  ;;  %v3122_v14 = vunpack.i.h.bf16 %v3120_v43  ;;  %v3121_v15 = vunpack.i.l.bf16 %v3120_v43 }
 0x27e   : > { %2875 = vmatmul.msk.f32.gmra.mxu2 %vm1536_vm8, %v2871_v41  ;;  %v2108_v9 = vsel %vm2101_vm12, %v3131_v40, %v3132_v48  ;;  %v2109_v51 = vsel %vm2101_vm12, %v3132_v48, %v3096_v39  ;;  %v2230_v1 = vsel %vm2225_vm13, %v3122_v14, %v3126_v24  ;;  %v3185_v7 = vpop.permute.xlu1 %3184  ;;  %v2907_v24 = vld [vmem:[%s4133_s6 + $0xc8] sm:$0xff] }
 0x27f   : > { %2879 = vmatmul.msk.f32.gmra.mxu3 %vm1536_vm8, %v2871_v41  ;;  %2142 = vmatpush.msrb.mxu2 %v2108_v9  ;;  %v3162_v41 = vunpack.i.h.bf16 %v3160_v57  ;;  %v3186_v14 = vunpack.i.l.bf16 %v3185_v7 }
 0x280   : > { %2171 = vmatpush.msrb.mxu3 %v2109_v51  ;;  %v2906_v51 = vld [vmem:[%s4133_s6 + $0xc0] sm:$0xff] }
 0x281   : > { %2143 = vmatpush.msrb.mxu2 %v2106_v61  ;;  %v2355_v61 = vsel %vm2349_vm14, %v3161_v46, %v3162_v41 }
 0x282   : > { %2172 = vmatpush.msrb.mxu3 %v2107_v11 }
 0x283   : > { %2886 = vmatmul.msk.f32.vlgmr.msrb.gmra.mxu0 %vm1536_vm8, %v2882_v3  ;;  %v3135_v44 = vpop.permute.xlu0 %3134  ;;  %v3145_v62 = vpop.permute.xlu2 %3144  ;;  %2144 = vmatpush.msrb.mxu2 %v2104_v59  ;;  %v2896_v59 = vld [vmem:[%s4133_s6 + $0xb0] sm:$0xff] }
 0x284   : > { %2890 = vmatmul.msk.f32.vlgmr.msrb.gmra.mxu1 %vm1536_vm8, %v2882_v3  ;;  %v3137_v60 = vunpack.i.h.bf16 %v3135_v44  ;;  %v3136_v23 = vunpack.i.l.bf16 %v3135_v44  ;;  %2173 = vmatpush.msrb.mxu3 %v2105_v63  ;;  %v3147_v47 = vunpack.i.h.bf16 %v3145_v62  ;;  %v3146_v36 = vunpack.i.l.bf16 %v3145_v62 }
 0x285   : > { %2145 = vmatpush.msrb.mxu2 %v2102_v13 }
 0x286   : > { %2174 = vmatpush.msrb.mxu3 %v2103_v38  ;;  %2876 = vmatmul.msk.f32.gmra.mxu2 %vm1536_vm8, %v2872_v25  ;;  %v2232_v0 = vsel %vm2225_vm13, %v3136_v23, %v3137_v60  ;;  %v2233_v16 = vsel %vm2225_vm13, %v3137_v60, %v3121_v15  ;;  %v2226_v26 = vsel %vm2225_vm13, %v3147_v47, %v3151_v18 }
 0x287   : > { %2880 = vmatmul.msk.f32.gmra.mxu3 %vm1536_vm8, %v2872_v25  ;;  %2266 = vmatpush.msra.mxu0 %v2232_v0  ;;  %v3187_v25 = vunpack.i.h.bf16 %v3185_v7  ;;  %v2351_v15 = vsel %vm2349_vm14, %v3176_v50, %v3177_v56  ;;  %v3210_v0 = vpop.permute.xlu1 %3209 }
 0x288   : > { %2295 = vmatpush.msra.mxu1 %v2233_v16  ;;  %v3212_v57 = vunpack.i.h.bf16 %v3210_v0  ;;  %v3211_v47 = vunpack.i.l.bf16 %v3210_v0 }
 0x289   : > { %2267 = vmatpush.msra.mxu0 %v2230_v1  ;;  %v2478_v38 = vsel %vm1631_vm10, %v3186_v14, %v3187_v25 }
 0x28a   : > { %2296 = vmatpush.msra.mxu1 %v2231_v12  ;;  %v2474_v18 = vsel %vm1631_vm10, %v3211_v47, %v3212_v57 }
 0x28b   : > { %2887 = vmatmul.msk.f32.gmra.mxu0 %vm1536_vm8, %v2883_v4  ;;  %v3140_v2 = vpop.permute.xlu0 %3139  ;;  %v3155_v5 = vpop.permute.xlu2 %3154 }
 0x28c   : > { %2891 = vmatmul.msk.f32.gmra.mxu1 %vm1536_vm8, %v2883_v4  ;;  %v3142_v37 = vunpack.i.h.bf16 %v3140_v2  ;;  %v3141_v27 = vunpack.i.l.bf16 %v3140_v2  ;;  %v3157_v30 = vunpack.i.h.bf16 %v3155_v5  ;;  %v3156_v31 = vunpack.i.l.bf16 %v3155_v5  ;;  %v2897_v4 = vld [vmem:[%s4133_s6 + $0xb8] sm:$0xff] }
 0x28e   : > { %2877 = vmatmul.msk.f32.gmra.mxu2 %vm1536_vm8, %v2873_v55  ;;  %v2228_v19 = vsel %vm2225_vm13, %v3141_v27, %v3142_v37  ;;  %v2229_v20 = vsel %vm2225_vm13, %v3142_v37, %v3146_v36  ;;  %v2354_v9 = vsel %vm2349_vm14, %v3157_v30, %v3161_v46  ;;  %v2933_v46 = vld [vmem:[%s4133_s6 + $0x118] sm:$0xff] }
 0x28f   : > { %2881 = vmatmul.msk.f32.gmra.mxu3 %vm1536_vm8, %v2873_v55  ;;  %2268 = vmatpush.msra.mxu0 %v2228_v19 }
 0x290   : > { %2297 = vmatpush.msra.mxu1 %v2229_v20  ;;  %v2918_v20 = vld [vmem:[%s4133_s6 + $0xe0] sm:$0xff] }
 0x291   : > { %2269 = vmatpush.msra.mxu0 %v2226_v26  ;;  %v2909_v26 = vld [vmem:[%s4133_s6 + $0xd8] sm:$0xff] }
 0x292   : > { %2298 = vmatpush.msra.mxu1 %v2227_v29 }
 0x293   : > { %2888 = vmatmul.msk.f32.gmra.mxu0 %vm1536_vm8, %v2884_v28  ;;  %v3165_v32 = vpop.permute.xlu0 %3164  ;;  %v3170_v21 = vpop.permute.xlu2 %3169 }
 0x294   : > { %2892 = vmatmul.msk.f32.gmra.mxu1 %vm1536_vm8, %v2884_v28  ;;  %v3167_v39 = vunpack.i.h.bf16 %v3165_v32  ;;  %v3166_v48 = vunpack.i.l.bf16 %v3165_v32  ;;  %v3172_v52 = vunpack.i.h.bf16 %v3170_v21  ;;  %v3171_v53 = vunpack.i.l.bf16 %v3170_v21  ;;  %v2919_v32 = vld [vmem:[%s4133_s6 + $0xe8] sm:$0xff]  ;;  %v2569_v21 = vld [vmem:[%s4134_s7 + $0x10] sm:$0xff] }
 0x295   : > { %2583 = vperm.xlu1 %3214, %v2569_v21  }
 0x296   : > { %2898 = vmatmul.msk.f32.vlgmr.msrb.gmra.mxu2 %vm1536_vm8, %v2894_v33  ;;  %v2352_v3 = vsel %vm2349_vm14, %v3166_v48, %v3167_v39  ;;  %v2353_v11 = vsel %vm2349_vm14, %v3167_v39, %v3171_v53  ;;  %v2350_v45 = vsel %vm2349_vm14, %v3172_v52, %v3176_v50 }
 0x297   : > { %2902 = vmatmul.msk.f32.vlgmr.msrb.gmra.mxu3 %vm1536_vm8, %v2894_v33  ;;  %v2930_v33 = vld [vmem:[%s4133_s6 + $0x100] sm:$0xff] }
 0x29b   : > { %2889 = vmatmul.msk.f32.gmra.mxu0 %vm1536_vm8, %v2885_v35  ;;  %v3190_v6 = vpop.permute.xlu0 %3189  ;;  %v3180_v8 = vpop.permute.xlu2 %3179 }
 0x29c   : > { %2893 = vmatmul.msk.f32.gmra.mxu1 %vm1536_vm8, %v2885_v35  ;;  %v3192_v42 = vunpack.i.h.bf16 %v3190_v6  ;;  %v3191_v43 = vunpack.i.l.bf16 %v3190_v6  ;;  %v3182_v44 = vunpack.i.h.bf16 %v3180_v8  ;;  %v3181_v62 = vunpack.i.l.bf16 %v3180_v8  ;;  %v2920_v6 = vld [vmem:[%s4133_s6 + $0xf0] sm:$0xff]  ;;  %v2931_v8 = vld [vmem:[%s4133_s6 + $0x108] sm:$0xff] }
 0x29e   : > { %2899 = vmatmul.msk.f32.gmra.mxu2 %vm1536_vm8, %v2895_v22  ;;  %v2356_v40 = vsel %vm2349_vm14, %v3191_v43, %v3192_v42  ;;  %v2357_v49 = vsel %vm2349_vm14, %v3192_v42, %v3156_v31  ;;  %v2477_v54 = vsel %vm1631_vm10, %v3182_v44, %v3186_v14  ;;  %v2932_v42 = vld [vmem:[%s4133_s6 + $0x110] sm:$0xff] }
 0x29f   : > { %2903 = vmatmul.msk.f32.gmra.mxu3 %vm1536_vm8, %v2895_v22  ;;  %2390 = vmatpush.msra.mxu2 %v2356_v40  ;;  %v2921_v22 = vld [vmem:[%s4133_s6 + $0xf8] sm:$0xff] }
 0x2a0   : > { %2419 = vmatpush.msra.mxu3 %v2357_v49 }
 0x2a1   : > { %2391 = vmatpush.msra.mxu2 %v2354_v9 }
 0x2a2   : > { %2420 = vmatpush.msra.mxu3 %v2355_v61 }
 0x2a3   : > { %2910 = vmatmul.msk.f32.vlgmr.msra.gmra.mxu0 %vm1536_vm8, %v2906_v51  ;;  %v3195_v58 = vpop.permute.xlu0 %3194  ;;  %v3205_v10 = vpop.permute.xlu2 %3204  ;;  %2392 = vmatpush.msra.mxu2 %v2352_v3 }
 0x2a4   : > { %2914 = vmatmul.msk.f32.vlgmr.msra.gmra.mxu1 %vm1536_vm8, %v2906_v51  ;;  %v3197_v63 = vunpack.i.h.bf16 %v3195_v58  ;;  %v3196_v13 = vunpack.i.l.bf16 %v3195_v58  ;;  %2421 = vmatpush.msra.mxu3 %v2353_v11  ;;  %v3207_v12 = vunpack.i.h.bf16 %v3205_v10  ;;  %v3206_v2 = vunpack.i.l.bf16 %v3205_v10 }
 0x2a5   : > { %2393 = vmatpush.msra.mxu2 %v2350_v45 }
 0x2a6   : > { %2422 = vmatpush.msra.mxu3 %v2351_v15  ;;  %2900 = vmatmul.msk.f32.gmra.mxu2 %vm1536_vm8, %v2896_v59  ;;  %v2479_v60 = vsel %vm1631_vm10, %v3196_v13, %v3197_v63  ;;  %v2480_v23 = vsel %vm1631_vm10, %v3197_v63, %v3181_v62  ;;  %v2473_v27 = vsel %vm1631_vm10, %v3207_v12, %v3211_v47 }
 0x2a7   : > { %2904 = vmatmul.msk.f32.gmra.mxu3 %vm1536_vm8, %v2896_v59  ;;  %2513 = vmatpush.msrb.mxu0 %v2479_v60 }
 0x2a8   : > { %2542 = vmatpush.msrb.mxu1 %v2480_v23 }
 0x2a9   : > { %2514 = vmatpush.msrb.mxu0 %v2477_v54 }
 0x2aa   : > { %2543 = vmatpush.msrb.mxu1 %v2478_v38 }
 0x2ab   : > { %2911 = vmatmul.msk.f32.gmra.mxu0 %vm1536_vm8, %v2907_v24  ;;  %v3200_v16 = vpop.permute.xlu0 %3199  ;;  %v4000_v1 = vpop.permute.xlu2 %2578 }
 0x2ac   : > { %2915 = vmatmul.msk.f32.gmra.mxu1 %vm1536_vm8, %v2907_v24  ;;  %v3202_v5 = vunpack.i.h.bf16 %v3200_v16  ;;  %v3201_v55 = vunpack.i.l.bf16 %v3200_v16 }
 0x2ae   : > { %2901 = vmatmul.msk.f32.gmra.mxu2 %vm1536_vm8, %v2897_v4  ;;  %v2475_v36 = vsel %vm1631_vm10, %v3201_v55, %v3202_v5  ;;  %v2476_v37 = vsel %vm1631_vm10, %v3202_v5, %v3206_v2 }
 0x2af   : > { %2905 = vmatmul.msk.f32.gmra.mxu3 %vm1536_vm8, %v2897_v4  ;;  %2515 = vmatpush.msrb.mxu0 %v2475_v36 }
 0x2b0   : > { %2544 = vmatpush.msrb.mxu1 %v2476_v37 }
 0x2b1   : > { %2516 = vmatpush.msrb.mxu0 %v2473_v27 }
 0x2b2   : > { %2545 = vmatpush.msrb.mxu1 %v2474_v18 }
 0x2b3   : > { %2912 = vmatmul.msk.f32.gmra.mxu0 %vm1536_vm8, %v2908_v17  ;;  %v397_v19 = vpop.permute.xlu2 %396 }
 0x2b4   : > { %2916 = vmatmul.msk.f32.gmra.mxu1 %vm1536_vm8, %v2908_v17  ;;  %399 = vst [vmem:[%s3562_s10 + $0x40] sm:$0xf0] %v397_v19 }
 0x2b5   : > { %400 = vst [vmem:[%s3562_s10 + $0x48] sm:$0xf0] %v397_v19 }
 0x2b6   : > { %2922 = vmatmul.msk.f32.vlgmr.msra.gmra.mxu2 %vm1536_vm8, %v2918_v20 }
 0x2b7   : > { %2926 = vmatmul.msk.f32.vlgmr.msra.gmra.mxu3 %vm1536_vm8, %v2918_v20 }
 0x2ba   : > { %v1566_v28 = vpop.f32.mrf.mxu0  ;;  %v1595_v29 = vpop.f32.mrf.mxu1 }
 0x2bb   : > { %2913 = vmatmul.msk.f32.gmra.mxu0 %vm1536_vm8, %v2909_v26 }
 0x2bc   : > { %2917 = vmatmul.msk.f32.gmra.mxu1 %vm1536_vm8, %v2909_v26 }
 0x2be   : > { %2923 = vmatmul.msk.f32.gmra.mxu2 %vm1536_vm8, %v2919_v32 }
 0x2bf   : > { %2927 = vmatmul.msk.f32.gmra.mxu3 %vm1536_vm8, %v2919_v32 }
 0x2c2   : > { %v1569_v34 = vpop.f32.mrf.mxu0  ;;  %v1598_v35 = vpop.f32.mrf.mxu1 }
 0x2c3   : > { %2934 = vmatmul.msk.f32.vlgmr.msrb.gmra.mxu0 %vm1536_vm8, %v2930_v33 }
 0x2c4   : > { %2938 = vmatmul.msk.f32.vlgmr.msrb.gmra.mxu1 %vm1536_vm8, %v2930_v33 }
 0x2c6   : > { %2924 = vmatmul.msk.f32.gmra.mxu2 %vm1536_vm8, %v2920_v6 }
 0x2c7   : > { %2928 = vmatmul.msk.f32.gmra.mxu3 %vm1536_vm8, %v2920_v6 }
 0x2ca   : > { %v1572_v30 = vpop.f32.mrf.mxu0  ;;  %v1601_v31 = vpop.f32.mrf.mxu1 }
 0x2cb   : > { %2935 = vmatmul.msk.f32.gmra.mxu0 %vm1536_vm8, %v2931_v8 }
 0x2cc   : > { %2939 = vmatmul.msk.f32.gmra.mxu1 %vm1536_vm8, %v2931_v8 }
 0x2ce   : > { %2925 = vmatmul.msk.f32.gmra.mxu2 %vm1536_vm8, %v2921_v22 }
 0x2cf   : > { %2929 = vmatmul.msk.f32.gmra.mxu3 %vm1536_vm8, %v2921_v22 }
 0x2d2   : > { %v1575_v43 = vpop.f32.mrf.mxu0 }
 0x2d3   : > { %2936 = vmatmul.msk.f32.gmra.mxu0 %vm1536_vm8, %v2932_v42 }
 0x2d4   : > { %2940 = vmatmul.msk.f32.gmra.mxu1 %vm1536_vm8, %v2932_v42 }
 0x2d6   : > { %v1604_v41 = vpop.f32.mrf.mxu1 }
 0x2d9   : > { %v1677_v39 = vpop.f32.mrf.mxu2 }
 0x2da   : > { %v1678_v48 = vadd.f32 %v1677_v39, %v1566_v28  ;;  %v1706_v40 = vpop.f32.mrf.mxu3 }
 0x2db   : > { %v1707_v49 = vadd.f32 %v1706_v40, %v1595_v29  ;;  %2937 = vmatmul.msk.f32.gmra.mxu0 %vm1536_vm8, %v2933_v46 }
 0x2dc   : > { %2941 = vmatmul.msk.f32.gmra.mxu1 %vm1536_vm8, %v2933_v46 }
 0x2df   : > { %v1792_v52 = vpop.f32.mrf.mxu0 }
 0x2e0   : > { %v1833_v53 = vadd.f32 %v1792_v52, %v1678_v48  ;;  %v1821_v7 = vpop.f32.mrf.mxu1 }
 0x2e1   : > { %v1834_v9 = vadd.f32 %v1821_v7, %v1707_v49  ;;  %v1680_v51 = vpop.f32.mrf.mxu2 }
 0x2e2   : > { %v1681_v56 = vadd.f32 %v1680_v51, %v1569_v34  ;;  %v1709_v50 = vpop.f32.mrf.mxu3 }
 0x2e3   : > { %v1710_v61 = vadd.f32 %v1709_v50, %v1598_v35 }
 0x2e8   : > { %v1795_v3 = vpop.f32.mrf.mxu0 }
 0x2e9   : > { %v1835_v58 = vadd.f32 %v1795_v3, %v1681_v56  ;;  %v1824_v10 = vpop.f32.mrf.mxu1  ;;  %v1683_v11 = vpop.f32.mrf.mxu2 }
 0x2ea   : > { %v1836_v45 = vadd.f32 %v1824_v10, %v1710_v61  ;;  %v1684_v59 = vadd.f32 %v1683_v11, %v1572_v30  ;;  %v1712_v44 = vpop.f32.mrf.mxu3 }
 0x2eb   : > { %v1713_v62 = vadd.f32 %v1712_v44, %v1601_v31 }
 0x2f0   : > { %v1798_v63 = vpop.f32.mrf.mxu0 }
 0x2f1   : > { %v4067_v13 = vadd.f32 %v1798_v63, %v1684_v59  ;;  %v1827_v25 = vpop.f32.mrf.mxu1  ;;  %v1686_v14 = vpop.f32.mrf.mxu2 }
 0x2f2   : > { %v4069_v15 = vadd.f32 %v1827_v25, %v1713_v62  ;;  %v1687_v60 = vadd.f32 %v1686_v14, %v1575_v43  ;;  %v1715_v23 = vpop.f32.mrf.mxu3  ;;  %v2574_v14 = vpop.permute.xlu0 %2573 }
 0x2f3   : > { %v1716_v54 = vadd.f32 %v1715_v23, %v1604_v41 }
 0x2f8   : > { %v1801_v24 = vpop.f32.mrf.mxu0 }
 0x2f9   : > { %v4071_v38 = vadd.f32 %v1801_v24, %v1687_v60  ;;  %v1830_v0 = vpop.f32.mrf.mxu1  ;;  %v1916_v16 = vpop.f32.mrf.mxu2 }
 0x2fa   : > { %v4073_v4 = vadd.f32 %v1830_v0, %v1716_v54  ;;  %v1945_v12 = vpop.f32.mrf.mxu3  ;;  %v1957_v46 = vadd.f32 %v1916_v16, %v1833_v53 }
 0x2fb   : > { %v1958_v39 = vadd.f32 %v1945_v12, %v1834_v9 }
 0x300   : > { %v1999_v2 = vpop.f32.mrf.mxu0 }
 0x301   : > { %v2028_v5 = vpop.f32.mrf.mxu1  ;;  %v1919_v55 = vpop.f32.mrf.mxu2  ;;  %v2040_v40 = vadd.f32 %v1999_v2, %v1957_v46 }
 0x302   : > { %v1948_v57 = vpop.f32.mrf.mxu3  ;;  %v2041_v7 = vadd.f32 %v2028_v5, %v1958_v39  ;;  %v1959_v10 = vadd.f32 %v1919_v55, %v1835_v58 }
 0x303   : > { %v1960_v59 = vadd.f32 %v1948_v57, %v1836_v45 }
 0x308   : > { %v2002_v47 = vpop.f32.mrf.mxu0 }
 0x309   : > { %v2031_v36 = vpop.f32.mrf.mxu1  ;;  %v1922_v37 = vpop.f32.mrf.mxu2  ;;  %v2042_v63 = vadd.f32 %v2002_v47, %v1959_v10 }
 0x30a   : > { %v1951_v27 = vpop.f32.mrf.mxu3  ;;  %v2043_v60 = vadd.f32 %v2031_v36, %v1960_v59  ;;  %v1961_v55 = vadd.f32 %v1922_v37, %v4067_v13 }
 0x310   : > { %v2005_v17 = vpop.f32.mrf.mxu0 }
 0x311   : > { %v4075_v18 = vpop.f32.mrf.mxu1  ;;  %v4077_v19 = vpop.f32.mrf.mxu2 }
 0x312   : > { %v4079_v20 = vpop.f32.mrf.mxu3 }
 0x318   : > { %v4081_v26 = vpop.f32.mrf.mxu0 }
 0x319   : > { %v4083_v28 = vpop.f32.mrf.mxu1  ;;  %v2147_v29 = vpop.f32.mrf.mxu2 }
 0x31a   : > { %v2176_v32 = vpop.f32.mrf.mxu3  ;;  %v2188_v56 = vadd.f32 %v2147_v29, %v2040_v40  ;;  %v1962_v29 = vadd.f32 %v1951_v27, %v4069_v15 }
 0x31b   : > { %v2189_v50 = vadd.f32 %v2176_v32, %v2041_v7 }
 0x320   : > { %v2271_v21 = vpop.f32.mrf.mxu0 }
 0x321   : > { %v2300_v33 = vpop.f32.mrf.mxu1  ;;  %v2150_v34 = vpop.f32.mrf.mxu2  ;;  %v2312_v61 = vadd.f32 %v2271_v21, %v2188_v56 }
 0x322   : > { %v2179_v35 = vpop.f32.mrf.mxu3  ;;  %v2313_v3 = vadd.f32 %v2300_v33, %v2189_v50  ;;  %v2190_v24 = vadd.f32 %v2150_v34, %v2042_v63  ;;  %v2044_v33 = vadd.f32 %v2005_v17, %v1961_v55 }
 0x323   : > { %v2191_v16 = vadd.f32 %v2179_v35, %v2043_v60  ;;  %v2045_v35 = vadd.f32 %v4075_v18, %v1962_v29 }
 0x328   : > { %v2274_v6 = vpop.f32.mrf.mxu0 }
 0x329   : > { %v2303_v8 = vpop.f32.mrf.mxu1  ;;  %v2153_v22 = vpop.f32.mrf.mxu2  ;;  %v2314_v2 = vadd.f32 %v2274_v6, %v2190_v24 }
 0x32a   : > { %v2182_v30 = vpop.f32.mrf.mxu3  ;;  %v2315_v5 = vadd.f32 %v2303_v8, %v2191_v16  ;;  %v2192_v8 = vadd.f32 %v2153_v22, %v2044_v33  ;;  %v1964_v22 = vadd.f32 %v4079_v20, %v4073_v4 }
 0x32b   : > { %v2193_v37 = vadd.f32 %v2182_v30, %v2045_v35  ;;  %v2584_v30 = vpop.permute.xlu1 %2583 }
 0x330   : > { %v2277_v31 = vpop.f32.mrf.mxu0 }
 0x331   : > { %v2306_v42 = vpop.f32.mrf.mxu1  ;;  %v4085_v43 = vpop.f32.mrf.mxu2  ;;  %v2316_v15 = vadd.f32 %v2277_v31, %v2192_v8 }
 0x332   : > { %v4087_v41 = vpop.f32.mrf.mxu3  ;;  %v2317_v7 = vadd.f32 %v2306_v42, %v2193_v37 }
 0x338   : > { %v4089_v48 = vpop.f32.mrf.mxu0 }
 0x339   : > { %v4091_v49 = vpop.f32.mrf.mxu1  ;;  %v2395_v52 = vpop.f32.mrf.mxu2 }
 0x33a   : > { %v2424_v51 = vpop.f32.mrf.mxu3  ;;  %v2436_v11 = vadd.f32 %v2395_v52, %v2312_v61 }
 0x33b   : > { %v2437_v44 = vadd.f32 %v2424_v51, %v2313_v3  ;;  %v1963_v51 = vadd.f32 %v4077_v19, %v4071_v38 }
 0x340   : > { %v2518_v62 = vpop.f32.mrf.mxu0 }
 0x341   : > { %v2559_v53 = vadd.f32 %v2518_v62, %v2436_v11  ;;  %v2547_v9 = vpop.f32.mrf.mxu1  ;;  %v2398_v25 = vpop.f32.mrf.mxu2  ;;  %v2047_v11 = vadd.f32 %v4083_v28, %v1964_v22 }
 0x342   : > { %v2560_v23 = vadd.f32 %v2547_v9, %v2437_v44  ;;  %v2427_v54 = vpop.f32.mrf.mxu3  ;;  %v2438_v47 = vadd.f32 %v2398_v25, %v2314_v2 }
 0x343   : > { %v2591_v0 = vadd.f32 %v2574_v14, %v2559_v53  ;;  %v2439_v36 = vadd.f32 %v2427_v54, %v2315_v5  ;;  %v2195_v20 = vadd.f32 %v4087_v41, %v2047_v11 }
 0x344   : > { %v2592_v12 = vadd.f32 %v2574_v14, %v2560_v23 }
 0x345   : > { %v2599_v58 = vmax.f32 %v2591_v0, 0.0  ;;  %v2319_v28 = vadd.f32 %v4091_v49, %v2195_v20  ;;  %v2589_v0 = vpop.permute.xlu0 %2588 }
 0x346   : > { %v2600_v45 = vmax.f32 %v2592_v12, 0.0 }
 0x347   : > { %v2615_v57 = vrot.slane %v2599_v58, 4 }
 0x348   : > { %v2616_v32 = vrot.slane %v2600_v45, 4  ;;  %v2521_v21 = vpop.f32.mrf.mxu0 }
 0x349   : > { %2639 = vst [vmem:[%s3562_s10] sm:$0xf0] %v2615_v57  ;;  %v2561_v34 = vadd.f32 %v2521_v21, %v2438_v47  ;;  %v2550_v46 = vpop.f32.mrf.mxu1  ;;  %v2401_v39 = vpop.f32.mrf.mxu2 }
 0x34a   : > { %2640 = vst [vmem:[%s3562_s10 + $0x8] sm:$0xf0] %v2616_v32  ;;  %v2562_v6 = vadd.f32 %v2550_v46, %v2439_v36  ;;  %v2430_v13 = vpop.f32.mrf.mxu3  ;;  %v2440_v18 = vadd.f32 %v2401_v39, %v2316_v15 }
 0x34b   : > { %v2593_v40 = vadd.f32 %v4000_v1, %v2561_v34  ;;  %v2441_v61 = vadd.f32 %v2430_v13, %v2317_v7 }
 0x34c   : > { %v2594_v52 = vadd.f32 %v4000_v1, %v2562_v6  ;;  %v2046_v1 = vadd.f32 %v4081_v26, %v1963_v51 }
 0x34d   : > { %v2601_v27 = vmax.f32 %v2593_v40, 0.0 }
 0x34e   : > { %v2602_v17 = vmax.f32 %v2594_v52, 0.0  ;;  %v2194_v59 = vadd.f32 %v4085_v43, %v2046_v1 }
 0x34f   : > { %v2617_v56 = vrot.slane %v2601_v27, 4 }
 0x350   : > { %v2619_v50 = vrot.slane %v2602_v17, 4  ;;  %v2524_v3 = vpop.f32.mrf.mxu0  ;;  %v2318_v26 = vadd.f32 %v4089_v48, %v2194_v59 }
 0x351   : > { %v2618_v31 = vsel %vm317_vm0, %v2615_v57, %v2617_v56  ;;  %v2563_v10 = vadd.f32 %v2524_v3, %v2440_v18  ;;  %v2553_v42 = vpop.f32.mrf.mxu1  ;;  %v2404_v62 = vpop.f32.mrf.mxu2 }
 0x352   : > { %2641 = vst [vmem:[%s3562_s10 + $0x10] sm:$0xff] %v2618_v31  ;;  %v2620_v38 = vsel %vm317_vm0, %v2616_v32, %v2619_v50  ;;  %v2564_v19 = vadd.f32 %v2553_v42, %v2441_v61  ;;  %v2433_v53 = vpop.f32.mrf.mxu3  ;;  %v2442_v14 = vadd.f32 %v2404_v62, %v2318_v26 }
 0x353   : > { %2642 = vst [vmem:[%s3562_s10 + $0x18] sm:$0xff] %v2620_v38  ;;  %v2595_v4 = vadd.f32 %v2584_v30, %v2563_v10  ;;  %v2443_v23 = vadd.f32 %v2433_v53, %v2319_v28 }
 0x354   : > { %v2596_v44 = vadd.f32 %v2584_v30, %v2564_v19 }
 0x355   : > { %v2603_v63 = vmax.f32 %v2595_v4, 0.0 }
 0x356   : > { %v2604_v9 = vmax.f32 %v2596_v44, 0.0 }
 0x357   : > { %v2621_v25 = vrot.slane %v2603_v63, 4 }
 0x358   : > { %v2623_v60 = vrot.slane %v2604_v9, 4  ;;  %v2527_v43 = vpop.f32.mrf.mxu0 }
 0x359   : > { %v2622_v54 = vsel %vm317_vm0, %v2617_v56, %v2621_v25  ;;  %v2565_v41 = vadd.f32 %v2527_v43, %v2442_v14  ;;  %v2556_v24 = vpop.f32.mrf.mxu1 }
 0x35a   : > { %v2624_v48 = vsel %vm317_vm0, %v2619_v50, %v2623_v60  ;;  %2643 = vst [vmem:[%s3562_s10 + $0x20] sm:$0xff] %v2622_v54  ;;  %v2566_v16 = vadd.f32 %v2556_v24, %v2443_v23 }
 0x35b   : > { %2644 = vst [vmem:[%s3562_s10 + $0x28] sm:$0xff] %v2624_v48  ;;  %v2597_v49 = vadd.f32 %v2589_v0, %v2565_v41 }
 0x35c   : > { %v2598_v12 = vadd.f32 %v2589_v0, %v2566_v16 }
 0x35d   : > { %v2605_v2 = vmax.f32 %v2597_v49, 0.0 }
 0x35e   : > { %v2606_v58 = vmax.f32 %v2598_v12, 0.0 }
 0x35f   : > { %v2625_v5 = vrot.slane %v2605_v2, 4 }
 0x360   : > { %v2627_v45 = vrot.slane %v2606_v58, 4 }
 0x361   : > { %v2626_v55 = vsel %vm317_vm0, %v2621_v25, %v2625_v5  ;;  %2647 = vst [vmem:[%s3562_s10 + $0x40] sm:$0xf] %v2625_v5 }
 0x362   : > { %2645 = vst [vmem:[%s3562_s10 + $0x30] sm:$0xff] %v2626_v55  ;;  %v2628_v57 = vsel %vm317_vm0, %v2623_v60, %v2627_v45 }
 0x363   : > { %2646 = vst [vmem:[%s3562_s10 + $0x38] sm:$0xff] %v2628_v57 }
 0x364   : > { %2648 = vst [vmem:[%s3562_s10 + $0x48] sm:$0xf] %v2627_v45 }
 0x365 PF: > { %s18_s27 = sadd.s32 1, %s3223_s27  }
 0x366   : > { %p15_p4 = scmp.ge.s32.totalorder %s18_s27, 4  }
 0x368   :  { %17 = sbr.rel (!%p15_p4) target bundleno = 1 (0x1), region = 106 }

</bundles_post_ra>
